<compile_context>
chip_gen: v7x
topology: tpu7x:2x2x1
jax: 0.10.0
libtpu: 0.0.40
codegen_flags: <defaults>
</compile_context>

<pallas_src>
import math
import functools

import jax
import jax.numpy as jnp
from jax.experimental import pallas as pl
from jax.experimental.pallas import tpu as pltpu

# ----------------- small synthetic CLIP-text-encoder dims -------------------
B = 2          # batch (number of prompts)
S = 8          # context length
D = 32         # transformer width
H = 4          # attention heads
DH = D // H    # head dim
LAYERS = 2     # transformer depth
FF = 4 * D     # mlp hidden width
E = 32         # text_projection output dim
EPS = 1e-5
NEG_INF = -1e9  # finite mask value (avoids inf-inf -> NaN on masked rows)


def _ln(v, w, b):
    """LayerNorm over the last axis (biased variance, matching torch)."""
    mu = jnp.mean(v, axis=-1, keepdims=True)
    var = jnp.mean((v - mu) ** 2, axis=-1, keepdims=True)
    return (v - mu) * jax.lax.rsqrt(var + EPS) * w + b


# ----------------------- fused encoder kernel -------------------------------
def encoder_kernel(eot_ref,                                  # scalar prefetch [B]
                   prompts_ref, pos_ref,
                   ln1w_ref, ln1b_ref,
                   wqkv_ref, bqkv_ref, wo_ref, bo_ref,
                   ln2w_ref, ln2b_ref,
                   wfc_ref, bfc_ref, wpj_ref, bpj_ref,
                   lnfw_ref, lnfb_ref, proj_ref,
                   o_ref,
                   x_scr,
                   *, num_heads, num_layers, batch):
    l = pl.program_id(0)

    # ---- layer 0: x = prompts + positional_embedding (kept resident) -------
    @pl.when(l == 0)
    def _():
        x_scr[...] = (prompts_ref[...] + pos_ref[...]).astype(jnp.float32)

    x = x_scr[...]                                           # [B, S, D] f32
    bsz, s_len, d = x.shape
    dh = d // num_heads
    t = bsz * s_len
    scale = 1.0 / math.sqrt(dh)
    cdt = wqkv_ref.dtype                                     # bf16 compute dtype

    # ---------------- x = x + MultiheadAttention(ln_1(x)) -------------------
    ln1x = _ln(x, ln1w_ref[0], ln1b_ref[0])                  # [B, S, D] f32
    # fused lane-dense QKV over all resident prompts: [B*S, D] @ [D, 3D]
    qkv = jnp.dot(ln1x.reshape(t, d).astype(cdt), wqkv_ref[0],
                  preferred_element_type=jnp.float32) + bqkv_ref[0]   # [T, 3D]
    q2 = qkv[:, 0:d] * scale                                 # scale after bias
    k2 = qkv[:, d:2 * d]
    v2 = qkv[:, 2 * d:3 * d]

    # causal mask built in-kernel (no [S,S] HBM stream)
    rows = jax.lax.broadcasted_iota(jnp.int32, (s_len, s_len), 0)
    cols = jax.lax.broadcasted_iota(jnp.int32, (s_len, s_len), 1)
    causal = jnp.where(cols > rows, NEG_INF, 0.0).astype(jnp.float32)

    wo_full = wo_ref[0]                                      # [D, D] bf16
    attn2d = jnp.zeros((t, d), jnp.float32)
    for h in range(num_heads):                               # unrolled, H small
        lo, hi = h * dh, (h + 1) * dh
        qh = q2[:, lo:hi].reshape(bsz, s_len, dh)            # [B, S, DH]
        kh = k2[:, lo:hi].reshape(bsz, s_len, dh)
        vh = v2[:, lo:hi].reshape(bsz, s_len, dh)

        sc = jnp.einsum('bqd,bkd->bqk', qh, kh,
                        preferred_element_type=jnp.float32)  # [B, S, S]
        sc = sc + causal
        sc = sc - jnp.max(sc, axis=-1, keepdims=True)
        p = jnp.exp(sc)
        p = p * pl.reciprocal(jnp.sum(p, axis=-1, keepdims=True), approx=True)

        ctx = jnp.einsum('bqk,bkd->bqd', p, vh,
                         preferred_element_type=jnp.float32)  # [B, S, DH]
        # accumulated head merge: sum_h ctx_h @ Wo_h  (== concat + Wo)
        attn2d = attn2d + jnp.dot(ctx.reshape(t, dh).astype(cdt),
                                  wo_full[lo:hi, :],
                                  preferred_element_type=jnp.float32)

    x = x + attn2d.reshape(bsz, s_len, d) + bo_ref[0]

    # ----------------------- x = x + MLP(ln_2(x)) ---------------------------
    ln2x = _ln(x, ln2w_ref[0], ln2b_ref[0])
    hid = jnp.dot(ln2x.reshape(t, d).astype(cdt), wfc_ref[0],
                  preferred_element_type=jnp.float32) + bfc_ref[0]   # [T, FF]
    hid = hid * jax.nn.sigmoid(1.702 * hid)                  # QuickGELU (CLIP)
    mlp2d = jnp.dot(hid.astype(cdt), wpj_ref[0],
                    preferred_element_type=jnp.float32) + bpj_ref[0]  # [T, D]
    x_scr[...] = x + mlp2d.reshape(bsz, s_len, d)

    # ---- last layer: ln_final + gather EOT token + @ text_projection -------
    @pl.when(l == num_layers - 1)
    def _():
        for b in range(batch):                               # static, B small
            idx = eot_ref[b]                                 # scalar from SMEM
            row = x_scr[pl.ds(b, 1), pl.ds(idx, 1), :][0]    # [1, D]
            nrm = _ln(row, lnfw_ref[...], lnfb_ref[...])
            emb = jnp.dot(nrm.astype(proj_ref.dtype), proj_ref[...],
                          preferred_element_type=jnp.float32)        # [1, E]
            o_ref[pl.ds(b, 1), :] = emb.astype(o_ref.dtype)


# ------------------------------- wrapper -------------------------------------
def text_encoder_forward(prompts, tokenized_prompts, params):
    # glue: argmax over token ids (tiny int reduction) done in plain JAX
    eot_idx = jnp.argmax(tokenized_prompts, axis=-1).astype(jnp.int32)

    full = lambda a: pl.BlockSpec(a.shape, lambda l, e: (0,) * a.ndim)
    per_layer = lambda a: pl.BlockSpec((1,) + a.shape[1:],
                                       lambda l, e: (l,) + (0,) * (a.ndim - 1))

    layer_keys = ("ln1_w", "ln1_b", "wqkv", "bqkv", "wo", "bo",
                  "ln2_w", "ln2_b", "wfc", "bfc", "wpj", "bpj")
    weights = ((params["pos"],)
               + tuple(params[k] for k in layer_keys)
               + (params["ln_f_w"], params["ln_f_b"], params["proj"]))

    in_specs = ([pl.BlockSpec((B, S, D), lambda l, e: (0, 0, 0)),   # prompts
                 full(params["pos"])]
                + [per_layer(params[k]) for k in layer_keys]
                + [full(params["ln_f_w"]), full(params["ln_f_b"]),
                   full(params["proj"])])

    out = pl.pallas_call(
        functools.partial(encoder_kernel, num_heads=H, num_layers=LAYERS,
                          batch=B),
        out_shape=jax.ShapeDtypeStruct((B, E), prompts.dtype),
        grid_spec=pltpu.PrefetchScalarGridSpec(
            num_scalar_prefetch=1,
            grid=(LAYERS,),                   # layer loop only; prompts resident
            in_specs=in_specs,
            out_specs=pl.BlockSpec((B, E), lambda l, e: (0, 0)),
            scratch_shapes=[pltpu.VMEM((B, S, D), jnp.float32)]),  # resident x
        compiler_params=pltpu.CompilerParams(
            dimension_semantics=("arbitrary",),      # carried layer loop
            vmem_limit_bytes=32 * 1024 * 1024),
    )(eot_idx, prompts, *weights)
    return out


# --------------------------- deterministic params -----------------------------
def init_params(key):
    keys = iter(jax.random.split(key, 16))

    def nrm(shape, scale=0.02, dtype=jnp.float32):
        return (scale * jax.random.normal(next(keys), shape)).astype(dtype)

    bf16 = jnp.bfloat16
    return {
        "pos": nrm((S, D), 0.01),                            # positional_embedding
        # per-layer stacked weights (leading LAYERS axis); matmul weights bf16
        "ln1_w": jnp.ones((LAYERS, 1, D), jnp.float32),
        "ln1_b": jnp.zeros((LAYERS, 1, D), jnp.float32),
        "wqkv": nrm((LAYERS, D, 3 * D), dtype=bf16),         # fused in_proj^T
        "bqkv": jnp.zeros((LAYERS, 1, 3 * D), jnp.float32),
        "wo": nrm((LAYERS, D, D), dtype=bf16),               # out_proj.weight^T
        "bo": jnp.zeros((LAYERS, 1, D), jnp.float32),
        "ln2_w": jnp.ones((LAYERS, 1, D), jnp.float32),
        "ln2_b": jnp.zeros((LAYERS, 1, D), jnp.float32),
        "wfc": nrm((LAYERS, D, FF), dtype=bf16),             # mlp.c_fc.weight^T
        "bfc": jnp.zeros((LAYERS, 1, FF), jnp.float32),
        "wpj": nrm((LAYERS, FF, D), dtype=bf16),             # mlp.c_proj.weight^T
        "bpj": jnp.zeros((LAYERS, 1, D), jnp.float32),
        # final LN + projection
        "ln_f_w": jnp.ones((1, D), jnp.float32),
        "ln_f_b": jnp.zeros((1, D), jnp.float32),
        "proj": nrm((D, E), D ** -0.5, dtype=bf16),
    }


if __name__ == "__main__":
    key = jax.random.PRNGKey(0)
    kp, kt, kw = jax.random.split(key, 3)

    prompts = jax.random.normal(kp, (B, S, D), jnp.float32)       # learned prompt embs
    tokenized = jax.random.randint(kt, (B, S), 1, 1000, jnp.int32)
    # place a distinct EOT token (largest id) per prompt, as CLIP tokenizer does
    tokenized = tokenized.at[0, 5].set(49407).at[1, 3].set(49407)

    params = init_params(kw)
    out = text_encoder_forward(prompts, tokenized, params)        # [B, E]
    jax.block_until_ready(out)
    assert out.shape == (B, E) and bool(jnp.all(jnp.isfinite(out)))
    print("KERNEL_OK")
</pallas_src>

<mosaic_0001>
module attributes {stable_mosaic.version = 11 : i64} {
  func.func @encoder_kernel(%arg0: i32, %arg1: memref<2xi32, #tpu.memory_space<smem>>, %arg2: memref<2x8x32xf32, #tpu.memory_space<vmem>>, %arg3: memref<8x32xf32, #tpu.memory_space<vmem>>, %arg4: memref<1x1x32xf32, #tpu.memory_space<vmem>>, %arg5: memref<1x1x32xf32, #tpu.memory_space<vmem>>, %arg6: memref<1x32x96xbf16, #tpu.memory_space<vmem>>, %arg7: memref<1x1x96xf32, #tpu.memory_space<vmem>>, %arg8: memref<1x32x32xbf16, #tpu.memory_space<vmem>>, %arg9: memref<1x1x32xf32, #tpu.memory_space<vmem>>, %arg10: memref<1x1x32xf32, #tpu.memory_space<vmem>>, %arg11: memref<1x1x32xf32, #tpu.memory_space<vmem>>, %arg12: memref<1x32x128xbf16, #tpu.memory_space<vmem>>, %arg13: memref<1x1x128xf32, #tpu.memory_space<vmem>>, %arg14: memref<1x128x32xbf16, #tpu.memory_space<vmem>>, %arg15: memref<1x1x32xf32, #tpu.memory_space<vmem>>, %arg16: memref<1x32xf32, #tpu.memory_space<vmem>>, %arg17: memref<1x32xf32, #tpu.memory_space<vmem>>, %arg18: memref<32x32xbf16, #tpu.memory_space<vmem>>, %arg19: memref<2x32xf32, #tpu.memory_space<vmem>>, %arg20: memref<2x8x32xf32, #tpu.memory_space<vmem>>) attributes {dimension_semantics = [#tpu.dimension_semantics<arbitrary>], iteration_bounds = array<i64: 2>, scalar_prefetch = 1 : i64, scratch_operands = 1 : i64, tpu.core_type = #tpu.core_type<tc>, window_params = [{pipeline_mode = #tpu.pipeline_mode<synchronous>, transform_indices = @transform_0, window_bounds = array<i64: 2, 8, 32>}, {pipeline_mode = #tpu.pipeline_mode<synchronous>, transform_indices = @transform_1, window_bounds = array<i64: 8, 32>}, {transform_indices = @transform_2, window_bounds = array<i64: 1, 1, 32>}, {transform_indices = @transform_3, window_bounds = array<i64: 1, 1, 32>}, {transform_indices = @transform_4, window_bounds = array<i64: 1, 32, 96>}, {transform_indices = @transform_5, window_bounds = array<i64: 1, 1, 96>}, {transform_indices = @transform_6, window_bounds = array<i64: 1, 32, 32>}, {transform_indices = @transform_7, window_bounds = array<i64: 1, 1, 32>}, {transform_indices = @transform_8, window_bounds = array<i64: 1, 1, 32>}, {transform_indices = @transform_9, window_bounds = array<i64: 1, 1, 32>}, {transform_indices = @transform_10, window_bounds = array<i64: 1, 32, 128>}, {transform_indices = @transform_11, window_bounds = array<i64: 1, 1, 128>}, {transform_indices = @transform_12, window_bounds = array<i64: 1, 128, 32>}, {transform_indices = @transform_13, window_bounds = array<i64: 1, 1, 32>}, {pipeline_mode = #tpu.pipeline_mode<synchronous>, transform_indices = @transform_14, window_bounds = array<i64: 1, 32>}, {pipeline_mode = #tpu.pipeline_mode<synchronous>, transform_indices = @transform_15, window_bounds = array<i64: 1, 32>}, {pipeline_mode = #tpu.pipeline_mode<synchronous>, transform_indices = @transform_16, window_bounds = array<i64: 32, 32>}, {pipeline_mode = #tpu.pipeline_mode<synchronous>, transform_indices = @transform_17, window_bounds = array<i64: 2, 32>}]} {
    %c0_i32 = arith.constant 0 : i32
    %0 = arith.cmpi eq, %arg0, %c0_i32 : i32
    %1 = arith.extui %0 : i1 to i32
    %c0_i32_0 = arith.constant 0 : i32
    %2 = arith.cmpi ne, %1, %c0_i32_0 : i32
    scf.if %2 {
      %c0_81 = arith.constant 0 : index
      %c0_82 = arith.constant 0 : index
      %c0_83 = arith.constant 0 : index
      %225 = vector.load %arg2[%c0_81, %c0_82, %c0_83] : memref<2x8x32xf32, #tpu.memory_space<vmem>>, vector<2x8x32xf32>
      %c0_84 = arith.constant 0 : index
      %c0_85 = arith.constant 0 : index
      %226 = vector.load %arg3[%c0_84, %c0_85] : memref<8x32xf32, #tpu.memory_space<vmem>>, vector<8x32xf32>
      %227 = vector.shape_cast %226 : vector<8x32xf32> to vector<1x8x32xf32>
      %228 = vector.broadcast %227 : vector<1x8x32xf32> to vector<2x8x32xf32>
      %229 = arith.addf %225, %228 : vector<2x8x32xf32>
      %c0_86 = arith.constant 0 : index
      %c0_87 = arith.constant 0 : index
      %c0_88 = arith.constant 0 : index
      %230 = vector.load %arg20[%c0_86, %c0_87, %c0_88] : memref<2x8x32xf32, #tpu.memory_space<vmem>>, vector<2x8x32xf32>
      tpu.vector_store %arg20[%c0_86, %c0_87, %c0_88], %229 {strides = array<i32>} : memref<2x8x32xf32, #tpu.memory_space<vmem>>, vector<2x8x32xf32>,
    } else {
    }
    %c0 = arith.constant 0 : index
    %c0_1 = arith.constant 0 : index
    %c0_2 = arith.constant 0 : index
    %3 = vector.load %arg20[%c0, %c0_1, %c0_2] : memref<2x8x32xf32, #tpu.memory_space<vmem>>, vector<2x8x32xf32>
    %c0_3 = arith.constant 0 : index
    %c0_4 = arith.constant 0 : index
    %c0_5 = arith.constant 0 : index
    %4 = vector.load %arg4[%c0_3, %c0_4, %c0_5] : memref<1x1x32xf32, #tpu.memory_space<vmem>>, vector<1x1x32xf32>
    %5 = vector.shape_cast %4 : vector<1x1x32xf32> to vector<1x32xf32>
    %c0_6 = arith.constant 0 : index
    %c0_7 = arith.constant 0 : index
    %c0_8 = arith.constant 0 : index
    %6 = vector.load %arg5[%c0_6, %c0_7, %c0_8] : memref<1x1x32xf32, #tpu.memory_space<vmem>>, vector<1x1x32xf32>
    %7 = vector.shape_cast %6 : vector<1x1x32xf32> to vector<1x32xf32>
    %cst = arith.constant dense<0.000000e+00> : vector<2x8xf32>
    %8 = vector.multi_reduction <add>, %3, %cst [2] : vector<2x8x32xf32> to vector<2x8xf32>
    %9 = vector.shape_cast %8 : vector<2x8xf32> to vector<2x8x1xf32>
    %cst_9 = arith.constant 3.200000e+01 : f32
    %10 = vector.broadcast %cst_9 : f32 to vector<2x8x1xf32>
    %11 = arith.divf %9, %10 : vector<2x8x1xf32>
    %12 = vector.broadcast %11 : vector<2x8x1xf32> to vector<2x8x32xf32>
    %13 = arith.subf %3, %12 : vector<2x8x32xf32>
    %14 = arith.mulf %13, %13 : vector<2x8x32xf32>
    %cst_10 = arith.constant dense<0.000000e+00> : vector<2x8xf32>
    %15 = vector.multi_reduction <add>, %14, %cst_10 [2] : vector<2x8x32xf32> to vector<2x8xf32>
    %16 = vector.shape_cast %15 : vector<2x8xf32> to vector<2x8x1xf32>
    %cst_11 = arith.constant 3.200000e+01 : f32
    %17 = vector.broadcast %cst_11 : f32 to vector<2x8x1xf32>
    %18 = arith.divf %16, %17 : vector<2x8x1xf32>
    %19 = vector.broadcast %11 : vector<2x8x1xf32> to vector<2x8x32xf32>
    %20 = arith.subf %3, %19 : vector<2x8x32xf32>
    %cst_12 = arith.constant 9.99999974E-6 : f32
    %21 = vector.broadcast %cst_12 : f32 to vector<2x8x1xf32>
    %22 = arith.addf %18, %21 : vector<2x8x1xf32>
    %23 = math.rsqrt %22 : vector<2x8x1xf32>
    %24 = vector.broadcast %23 : vector<2x8x1xf32> to vector<2x8x32xf32>
    %25 = arith.mulf %20, %24 : vector<2x8x32xf32>
    %26 = vector.shape_cast %5 : vector<1x32xf32> to vector<1x1x32xf32>
    %27 = vector.broadcast %26 : vector<1x1x32xf32> to vector<2x8x32xf32>
    %28 = arith.mulf %25, %27 : vector<2x8x32xf32>
    %29 = vector.shape_cast %7 : vector<1x32xf32> to vector<1x1x32xf32>
    %30 = vector.broadcast %29 : vector<1x1x32xf32> to vector<2x8x32xf32>
    %31 = arith.addf %28, %30 : vector<2x8x32xf32>
    %32 = vector.shape_cast %31 : vector<2x8x32xf32> to vector<16x32xf32>
    %33 = arith.truncf %32 : vector<16x32xf32> to vector<16x32xbf16>
    %c0_13 = arith.constant 0 : index
    %c0_14 = arith.constant 0 : index
    %c0_15 = arith.constant 0 : index
    %34 = vector.load %arg6[%c0_13, %c0_14, %c0_15] : memref<1x32x96xbf16, #tpu.memory_space<vmem>>, vector<1x32x96xbf16>
    %35 = vector.shape_cast %34 : vector<1x32x96xbf16> to vector<32x96xbf16>
    %cst_16 = arith.constant dense<0.000000e+00> : vector<16x96xf32>
    %36 = tpu.matmul %33, %35, %cst_16 {dimension_numbers = #tpu.dot_dimension_numbers<[1], [0], [0], [1], [0, 0, 1, 1], [], []>} : vector<16x32xbf16>, vector<32x96xbf16>, vector<16x96xf32> -> vector<16x96xf32>
    %c0_17 = arith.constant 0 : index
    %c0_18 = arith.constant 0 : index
    %c0_19 = arith.constant 0 : index
    %37 = vector.load %arg7[%c0_17, %c0_18, %c0_19] : memref<1x1x96xf32, #tpu.memory_space<vmem>>, vector<1x1x96xf32>
    %38 = vector.shape_cast %37 : vector<1x1x96xf32> to vector<1x96xf32>
    %39 = vector.broadcast %38 : vector<1x96xf32> to vector<16x96xf32>
    %40 = arith.addf %36, %39 : vector<16x96xf32>
    %41 = vector.extract_strided_slice %40 {offsets = [0, 0], sizes = [16, 32], strides = [1, 1]} : vector<16x96xf32> to vector<16x32xf32>
    %cst_20 = arith.constant 0.353553385 : f32
    %42 = vector.broadcast %cst_20 : f32 to vector<16x32xf32>
    %43 = arith.mulf %41, %42 : vector<16x32xf32>
    %44 = vector.extract_strided_slice %40 {offsets = [0, 32], sizes = [16, 32], strides = [1, 1]} : vector<16x96xf32> to vector<16x32xf32>
    %45 = vector.extract_strided_slice %40 {offsets = [0, 64], sizes = [16, 32], strides = [1, 1]} : vector<16x96xf32> to vector<16x32xf32>
    %46 = tpu.iota {dimensions = array<i32: 0>} : vector<8x8xi32>
    %47 = tpu.iota {dimensions = array<i32: 1>} : vector<8x8xi32>
    %48 = arith.cmpi sgt, %47, %46 : vector<8x8xi32>
    %cst_21 = arith.constant -1.000000e+09 : f32
    %cst_22 = arith.constant 0.000000e+00 : f32
    %49 = vector.broadcast %cst_21 : f32 to vector<8x8xf32>
    %50 = vector.broadcast %cst_22 : f32 to vector<8x8xf32>
    %51 = arith.select %48, %49, %50 : vector<8x8xi1>, vector<8x8xf32>
    %c0_23 = arith.constant 0 : index
    %c0_24 = arith.constant 0 : index
    %c0_25 = arith.constant 0 : index
    %52 = vector.load %arg8[%c0_23, %c0_24, %c0_25] : memref<1x32x32xbf16, #tpu.memory_space<vmem>>, vector<1x32x32xbf16>
    %53 = vector.shape_cast %52 : vector<1x32x32xbf16> to vector<32x32xbf16>
    %cst_26 = arith.constant 0.000000e+00 : f32
    %54 = vector.broadcast %cst_26 : f32 to vector<16x32xf32>
    %55 = vector.extract_strided_slice %43 {offsets = [0, 0], sizes = [16, 8], strides = [1, 1]} : vector<16x32xf32> to vector<16x8xf32>
    %56 = vector.shape_cast %55 : vector<16x8xf32> to vector<2x8x8xf32>
    %57 = vector.extract_strided_slice %44 {offsets = [0, 0], sizes = [16, 8], strides = [1, 1]} : vector<16x32xf32> to vector<16x8xf32>
    %58 = vector.shape_cast %57 : vector<16x8xf32> to vector<2x8x8xf32>
    %59 = vector.extract_strided_slice %45 {offsets = [0, 0], sizes = [16, 8], strides = [1, 1]} : vector<16x32xf32> to vector<16x8xf32>
    %60 = vector.shape_cast %59 : vector<16x8xf32> to vector<2x8x8xf32>
    "tpu.trace_start"() <{level = 10 : i32, message = "bqd,bkd->bqk"}> : () -> ()
    %cst_27 = arith.constant dense<0.000000e+00> : vector<2x8x8xf32>
    %61 = tpu.matmul %56, %58, %cst_27 {dimension_numbers = #tpu.dot_dimension_numbers<[2], [2], [1], [1], [0, 0, 0, 1, 1, 1], [0], [0]>} : vector<2x8x8xf32>, vector<2x8x8xf32>, vector<2x8x8xf32> -> vector<2x8x8xf32>
    "tpu.trace_stop"() : () -> ()
    %62 = vector.shape_cast %51 : vector<8x8xf32> to vector<1x8x8xf32>
    %63 = vector.broadcast %62 : vector<1x8x8xf32> to vector<2x8x8xf32>
    %64 = arith.addf %61, %63 : vector<2x8x8xf32>
    %cst_28 = arith.constant dense<0xFF800000> : vector<2x8xf32>
    %65 = vector.multi_reduction <maximumf>, %64, %cst_28 [2] : vector<2x8x8xf32> to vector<2x8xf32>
    %66 = vector.shape_cast %65 : vector<2x8xf32> to vector<2x8x1xf32>
    %67 = vector.broadcast %66 : vector<2x8x1xf32> to vector<2x8x8xf32>
    %68 = arith.subf %64, %67 : vector<2x8x8xf32>
    %69 = math.exp %68 : vector<2x8x8xf32>
    %cst_29 = arith.constant dense<0.000000e+00> : vector<2x8xf32>
    %70 = vector.multi_reduction <add>, %69, %cst_29 [2] : vector<2x8x8xf32> to vector<2x8xf32>
    %71 = vector.shape_cast %70 : vector<2x8xf32> to vector<2x8x1xf32>
    %72 = tpu.reciprocal %71 {approx = true} : vector<2x8x1xf32> -> vector<2x8x1xf32>
    %73 = vector.broadcast %72 : vector<2x8x1xf32> to vector<2x8x8xf32>
    %74 = arith.mulf %69, %73 : vector<2x8x8xf32>
    "tpu.trace_start"() <{level = 10 : i32, message = "bqk,bkd->bqd"}> : () -> ()
    %cst_30 = arith.constant dense<0.000000e+00> : vector<2x8x8xf32>
    %75 = tpu.matmul %74, %60, %cst_30 {dimension_numbers = #tpu.dot_dimension_numbers<[2], [1], [1], [2], [0, 0, 0, 1, 1, 2], [0], [0]>} : vector<2x8x8xf32>, vector<2x8x8xf32>, vector<2x8x8xf32> -> vector<2x8x8xf32>
    "tpu.trace_stop"() : () -> ()
    %76 = vector.shape_cast %75 : vector<2x8x8xf32> to vector<16x8xf32>
    %77 = arith.truncf %76 : vector<16x8xf32> to vector<16x8xbf16>
    %78 = vector.extract_strided_slice %53 {offsets = [0, 0], sizes = [8, 32], strides = [1, 1]} : vector<32x32xbf16> to vector<8x32xbf16>
    %cst_31 = arith.constant dense<0.000000e+00> : vector<16x32xf32>
    %79 = tpu.matmul %77, %78, %cst_31 {dimension_numbers = #tpu.dot_dimension_numbers<[1], [0], [0], [1], [0, 0, 1, 1], [], []>} : vector<16x8xbf16>, vector<8x32xbf16>, vector<16x32xf32> -> vector<16x32xf32>
    %80 = arith.addf %54, %79 : vector<16x32xf32>
    %81 = vector.extract_strided_slice %43 {offsets = [0, 8], sizes = [16, 8], strides = [1, 1]} : vector<16x32xf32> to vector<16x8xf32>
    %82 = vector.shape_cast %81 : vector<16x8xf32> to vector<2x8x8xf32>
    %83 = vector.extract_strided_slice %44 {offsets = [0, 8], sizes = [16, 8], strides = [1, 1]} : vector<16x32xf32> to vector<16x8xf32>
    %84 = vector.shape_cast %83 : vector<16x8xf32> to vector<2x8x8xf32>
    %85 = vector.extract_strided_slice %45 {offsets = [0, 8], sizes = [16, 8], strides = [1, 1]} : vector<16x32xf32> to vector<16x8xf32>
    %86 = vector.shape_cast %85 : vector<16x8xf32> to vector<2x8x8xf32>
    "tpu.trace_start"() <{level = 10 : i32, message = "bqd,bkd->bqk"}> : () -> ()
    %cst_32 = arith.constant dense<0.000000e+00> : vector<2x8x8xf32>
    %87 = tpu.matmul %82, %84, %cst_32 {dimension_numbers = #tpu.dot_dimension_numbers<[2], [2], [1], [1], [0, 0, 0, 1, 1, 1], [0], [0]>} : vector<2x8x8xf32>, vector<2x8x8xf32>, vector<2x8x8xf32> -> vector<2x8x8xf32>
    "tpu.trace_stop"() : () -> ()
    %88 = vector.shape_cast %51 : vector<8x8xf32> to vector<1x8x8xf32>
    %89 = vector.broadcast %88 : vector<1x8x8xf32> to vector<2x8x8xf32>
    %90 = arith.addf %87, %89 : vector<2x8x8xf32>
    %cst_33 = arith.constant dense<0xFF800000> : vector<2x8xf32>
    %91 = vector.multi_reduction <maximumf>, %90, %cst_33 [2] : vector<2x8x8xf32> to vector<2x8xf32>
    %92 = vector.shape_cast %91 : vector<2x8xf32> to vector<2x8x1xf32>
    %93 = vector.broadcast %92 : vector<2x8x1xf32> to vector<2x8x8xf32>
    %94 = arith.subf %90, %93 : vector<2x8x8xf32>
    %95 = math.exp %94 : vector<2x8x8xf32>
    %cst_34 = arith.constant dense<0.000000e+00> : vector<2x8xf32>
    %96 = vector.multi_reduction <add>, %95, %cst_34 [2] : vector<2x8x8xf32> to vector<2x8xf32>
    %97 = vector.shape_cast %96 : vector<2x8xf32> to vector<2x8x1xf32>
    %98 = tpu.reciprocal %97 {approx = true} : vector<2x8x1xf32> -> vector<2x8x1xf32>
    %99 = vector.broadcast %98 : vector<2x8x1xf32> to vector<2x8x8xf32>
    %100 = arith.mulf %95, %99 : vector<2x8x8xf32>
    "tpu.trace_start"() <{level = 10 : i32, message = "bqk,bkd->bqd"}> : () -> ()
    %cst_35 = arith.constant dense<0.000000e+00> : vector<2x8x8xf32>
    %101 = tpu.matmul %100, %86, %cst_35 {dimension_numbers = #tpu.dot_dimension_numbers<[2], [1], [1], [2], [0, 0, 0, 1, 1, 2], [0], [0]>} : vector<2x8x8xf32>, vector<2x8x8xf32>, vector<2x8x8xf32> -> vector<2x8x8xf32>
    "tpu.trace_stop"() : () -> ()
    %102 = vector.shape_cast %101 : vector<2x8x8xf32> to vector<16x8xf32>
    %103 = arith.truncf %102 : vector<16x8xf32> to vector<16x8xbf16>
    %104 = vector.extract_strided_slice %53 {offsets = [8, 0], sizes = [8, 32], strides = [1, 1]} : vector<32x32xbf16> to vector<8x32xbf16>
    %cst_36 = arith.constant dense<0.000000e+00> : vector<16x32xf32>
    %105 = tpu.matmul %103, %104, %cst_36 {dimension_numbers = #tpu.dot_dimension_numbers<[1], [0], [0], [1], [0, 0, 1, 1], [], []>} : vector<16x8xbf16>, vector<8x32xbf16>, vector<16x32xf32> -> vector<16x32xf32>
    %106 = arith.addf %80, %105 : vector<16x32xf32>
    %107 = vector.extract_strided_slice %43 {offsets = [0, 16], sizes = [16, 8], strides = [1, 1]} : vector<16x32xf32> to vector<16x8xf32>
    %108 = vector.shape_cast %107 : vector<16x8xf32> to vector<2x8x8xf32>
    %109 = vector.extract_strided_slice %44 {offsets = [0, 16], sizes = [16, 8], strides = [1, 1]} : vector<16x32xf32> to vector<16x8xf32>
    %110 = vector.shape_cast %109 : vector<16x8xf32> to vector<2x8x8xf32>
    %111 = vector.extract_strided_slice %45 {offsets = [0, 16], sizes = [16, 8], strides = [1, 1]} : vector<16x32xf32> to vector<16x8xf32>
    %112 = vector.shape_cast %111 : vector<16x8xf32> to vector<2x8x8xf32>
    "tpu.trace_start"() <{level = 10 : i32, message = "bqd,bkd->bqk"}> : () -> ()
    %cst_37 = arith.constant dense<0.000000e+00> : vector<2x8x8xf32>
    %113 = tpu.matmul %108, %110, %cst_37 {dimension_numbers = #tpu.dot_dimension_numbers<[2], [2], [1], [1], [0, 0, 0, 1, 1, 1], [0], [0]>} : vector<2x8x8xf32>, vector<2x8x8xf32>, vector<2x8x8xf32> -> vector<2x8x8xf32>
    "tpu.trace_stop"() : () -> ()
    %114 = vector.shape_cast %51 : vector<8x8xf32> to vector<1x8x8xf32>
    %115 = vector.broadcast %114 : vector<1x8x8xf32> to vector<2x8x8xf32>
    %116 = arith.addf %113, %115 : vector<2x8x8xf32>
    %cst_38 = arith.constant dense<0xFF800000> : vector<2x8xf32>
    %117 = vector.multi_reduction <maximumf>, %116, %cst_38 [2] : vector<2x8x8xf32> to vector<2x8xf32>
    %118 = vector.shape_cast %117 : vector<2x8xf32> to vector<2x8x1xf32>
    %119 = vector.broadcast %118 : vector<2x8x1xf32> to vector<2x8x8xf32>
    %120 = arith.subf %116, %119 : vector<2x8x8xf32>
    %121 = math.exp %120 : vector<2x8x8xf32>
    %cst_39 = arith.constant dense<0.000000e+00> : vector<2x8xf32>
    %122 = vector.multi_reduction <add>, %121, %cst_39 [2] : vector<2x8x8xf32> to vector<2x8xf32>
    %123 = vector.shape_cast %122 : vector<2x8xf32> to vector<2x8x1xf32>
    %124 = tpu.reciprocal %123 {approx = true} : vector<2x8x1xf32> -> vector<2x8x1xf32>
    %125 = vector.broadcast %124 : vector<2x8x1xf32> to vector<2x8x8xf32>
    %126 = arith.mulf %121, %125 : vector<2x8x8xf32>
    "tpu.trace_start"() <{level = 10 : i32, message = "bqk,bkd->bqd"}> : () -> ()
    %cst_40 = arith.constant dense<0.000000e+00> : vector<2x8x8xf32>
    %127 = tpu.matmul %126, %112, %cst_40 {dimension_numbers = #tpu.dot_dimension_numbers<[2], [1], [1], [2], [0, 0, 0, 1, 1, 2], [0], [0]>} : vector<2x8x8xf32>, vector<2x8x8xf32>, vector<2x8x8xf32> -> vector<2x8x8xf32>
    "tpu.trace_stop"() : () -> ()
    %128 = vector.shape_cast %127 : vector<2x8x8xf32> to vector<16x8xf32>
    %129 = arith.truncf %128 : vector<16x8xf32> to vector<16x8xbf16>
    %130 = vector.extract_strided_slice %53 {offsets = [16, 0], sizes = [8, 32], strides = [1, 1]} : vector<32x32xbf16> to vector<8x32xbf16>
    %cst_41 = arith.constant dense<0.000000e+00> : vector<16x32xf32>
    %131 = tpu.matmul %129, %130, %cst_41 {dimension_numbers = #tpu.dot_dimension_numbers<[1], [0], [0], [1], [0, 0, 1, 1], [], []>} : vector<16x8xbf16>, vector<8x32xbf16>, vector<16x32xf32> -> vector<16x32xf32>
    %132 = arith.addf %106, %131 : vector<16x32xf32>
    %133 = vector.extract_strided_slice %43 {offsets = [0, 24], sizes = [16, 8], strides = [1, 1]} : vector<16x32xf32> to vector<16x8xf32>
    %134 = vector.shape_cast %133 : vector<16x8xf32> to vector<2x8x8xf32>
    %135 = vector.extract_strided_slice %44 {offsets = [0, 24], sizes = [16, 8], strides = [1, 1]} : vector<16x32xf32> to vector<16x8xf32>
    %136 = vector.shape_cast %135 : vector<16x8xf32> to vector<2x8x8xf32>
    %137 = vector.extract_strided_slice %45 {offsets = [0, 24], sizes = [16, 8], strides = [1, 1]} : vector<16x32xf32> to vector<16x8xf32>
    %138 = vector.shape_cast %137 : vector<16x8xf32> to vector<2x8x8xf32>
    "tpu.trace_start"() <{level = 10 : i32, message = "bqd,bkd->bqk"}> : () -> ()
    %cst_42 = arith.constant dense<0.000000e+00> : vector<2x8x8xf32>
    %139 = tpu.matmul %134, %136, %cst_42 {dimension_numbers = #tpu.dot_dimension_numbers<[2], [2], [1], [1], [0, 0, 0, 1, 1, 1], [0], [0]>} : vector<2x8x8xf32>, vector<2x8x8xf32>, vector<2x8x8xf32> -> vector<2x8x8xf32>
    "tpu.trace_stop"() : () -> ()
    %140 = vector.shape_cast %51 : vector<8x8xf32> to vector<1x8x8xf32>
    %141 = vector.broadcast %140 : vector<1x8x8xf32> to vector<2x8x8xf32>
    %142 = arith.addf %139, %141 : vector<2x8x8xf32>
    %cst_43 = arith.constant dense<0xFF800000> : vector<2x8xf32>
    %143 = vector.multi_reduction <maximumf>, %142, %cst_43 [2] : vector<2x8x8xf32> to vector<2x8xf32>
    %144 = vector.shape_cast %143 : vector<2x8xf32> to vector<2x8x1xf32>
    %145 = vector.broadcast %144 : vector<2x8x1xf32> to vector<2x8x8xf32>
    %146 = arith.subf %142, %145 : vector<2x8x8xf32>
    %147 = math.exp %146 : vector<2x8x8xf32>
    %cst_44 = arith.constant dense<0.000000e+00> : vector<2x8xf32>
    %148 = vector.multi_reduction <add>, %147, %cst_44 [2] : vector<2x8x8xf32> to vector<2x8xf32>
    %149 = vector.shape_cast %148 : vector<2x8xf32> to vector<2x8x1xf32>
    %150 = tpu.reciprocal %149 {approx = true} : vector<2x8x1xf32> -> vector<2x8x1xf32>
    %151 = vector.broadcast %150 : vector<2x8x1xf32> to vector<2x8x8xf32>
    %152 = arith.mulf %147, %151 : vector<2x8x8xf32>
    "tpu.trace_start"() <{level = 10 : i32, message = "bqk,bkd->bqd"}> : () -> ()
    %cst_45 = arith.constant dense<0.000000e+00> : vector<2x8x8xf32>
    %153 = tpu.matmul %152, %138, %cst_45 {dimension_numbers = #tpu.dot_dimension_numbers<[2], [1], [1], [2], [0, 0, 0, 1, 1, 2], [0], [0]>} : vector<2x8x8xf32>, vector<2x8x8xf32>, vector<2x8x8xf32> -> vector<2x8x8xf32>
    "tpu.trace_stop"() : () -> ()
    %154 = vector.shape_cast %153 : vector<2x8x8xf32> to vector<16x8xf32>
    %155 = arith.truncf %154 : vector<16x8xf32> to vector<16x8xbf16>
    %156 = vector.extract_strided_slice %53 {offsets = [24, 0], sizes = [8, 32], strides = [1, 1]} : vector<32x32xbf16> to vector<8x32xbf16>
    %cst_46 = arith.constant dense<0.000000e+00> : vector<16x32xf32>
    %157 = tpu.matmul %155, %156, %cst_46 {dimension_numbers = #tpu.dot_dimension_numbers<[1], [0], [0], [1], [0, 0, 1, 1], [], []>} : vector<16x8xbf16>, vector<8x32xbf16>, vector<16x32xf32> -> vector<16x32xf32>
    %158 = arith.addf %132, %157 : vector<16x32xf32>
    %159 = vector.shape_cast %158 : vector<16x32xf32> to vector<2x8x32xf32>
    %160 = arith.addf %3, %159 : vector<2x8x32xf32>
    %c0_47 = arith.constant 0 : index
    %c0_48 = arith.constant 0 : index
    %c0_49 = arith.constant 0 : index
    %161 = vector.load %arg9[%c0_47, %c0_48, %c0_49] : memref<1x1x32xf32, #tpu.memory_space<vmem>>, vector<1x1x32xf32>
    %162 = vector.shape_cast %161 : vector<1x1x32xf32> to vector<1x32xf32>
    %163 = vector.shape_cast %162 : vector<1x32xf32> to vector<1x1x32xf32>
    %164 = vector.broadcast %163 : vector<1x1x32xf32> to vector<2x8x32xf32>
    %165 = arith.addf %160, %164 : vector<2x8x32xf32>
    %c0_50 = arith.constant 0 : index
    %c0_51 = arith.constant 0 : index
    %c0_52 = arith.constant 0 : index
    %166 = vector.load %arg10[%c0_50, %c0_51, %c0_52] : memref<1x1x32xf32, #tpu.memory_space<vmem>>, vector<1x1x32xf32>
    %167 = vector.shape_cast %166 : vector<1x1x32xf32> to vector<1x32xf32>
    %c0_53 = arith.constant 0 : index
    %c0_54 = arith.constant 0 : index
    %c0_55 = arith.constant 0 : index
    %168 = vector.load %arg11[%c0_53, %c0_54, %c0_55] : memref<1x1x32xf32, #tpu.memory_space<vmem>>, vector<1x1x32xf32>
    %169 = vector.shape_cast %168 : vector<1x1x32xf32> to vector<1x32xf32>
    %cst_56 = arith.constant dense<0.000000e+00> : vector<2x8xf32>
    %170 = vector.multi_reduction <add>, %165, %cst_56 [2] : vector<2x8x32xf32> to vector<2x8xf32>
    %171 = vector.shape_cast %170 : vector<2x8xf32> to vector<2x8x1xf32>
    %cst_57 = arith.constant 3.200000e+01 : f32
    %172 = vector.broadcast %cst_57 : f32 to vector<2x8x1xf32>
    %173 = arith.divf %171, %172 : vector<2x8x1xf32>
    %174 = vector.broadcast %173 : vector<2x8x1xf32> to vector<2x8x32xf32>
    %175 = arith.subf %165, %174 : vector<2x8x32xf32>
    %176 = arith.mulf %175, %175 : vector<2x8x32xf32>
    %cst_58 = arith.constant dense<0.000000e+00> : vector<2x8xf32>
    %177 = vector.multi_reduction <add>, %176, %cst_58 [2] : vector<2x8x32xf32> to vector<2x8xf32>
    %178 = vector.shape_cast %177 : vector<2x8xf32> to vector<2x8x1xf32>
    %cst_59 = arith.constant 3.200000e+01 : f32
    %179 = vector.broadcast %cst_59 : f32 to vector<2x8x1xf32>
    %180 = arith.divf %178, %179 : vector<2x8x1xf32>
    %181 = vector.broadcast %173 : vector<2x8x1xf32> to vector<2x8x32xf32>
    %182 = arith.subf %165, %181 : vector<2x8x32xf32>
    %cst_60 = arith.constant 9.99999974E-6 : f32
    %183 = vector.broadcast %cst_60 : f32 to vector<2x8x1xf32>
    %184 = arith.addf %180, %183 : vector<2x8x1xf32>
    %185 = math.rsqrt %184 : vector<2x8x1xf32>
    %186 = vector.broadcast %185 : vector<2x8x1xf32> to vector<2x8x32xf32>
    %187 = arith.mulf %182, %186 : vector<2x8x32xf32>
    %188 = vector.shape_cast %167 : vector<1x32xf32> to vector<1x1x32xf32>
    %189 = vector.broadcast %188 : vector<1x1x32xf32> to vector<2x8x32xf32>
    %190 = arith.mulf %187, %189 : vector<2x8x32xf32>
    %191 = vector.shape_cast %169 : vector<1x32xf32> to vector<1x1x32xf32>
    %192 = vector.broadcast %191 : vector<1x1x32xf32> to vector<2x8x32xf32>
    %193 = arith.addf %190, %192 : vector<2x8x32xf32>
    %194 = vector.shape_cast %193 : vector<2x8x32xf32> to vector<16x32xf32>
    %195 = arith.truncf %194 : vector<16x32xf32> to vector<16x32xbf16>
    %c0_61 = arith.constant 0 : index
    %c0_62 = arith.constant 0 : index
    %c0_63 = arith.constant 0 : index
    %196 = vector.load %arg12[%c0_61, %c0_62, %c0_63] : memref<1x32x128xbf16, #tpu.memory_space<vmem>>, vector<1x32x128xbf16>
    %197 = vector.shape_cast %196 : vector<1x32x128xbf16> to vector<32x128xbf16>
    %cst_64 = arith.constant dense<0.000000e+00> : vector<16x128xf32>
    %198 = tpu.matmul %195, %197, %cst_64 {dimension_numbers = #tpu.dot_dimension_numbers<[1], [0], [0], [1], [0, 0, 1, 1], [], []>} : vector<16x32xbf16>, vector<32x128xbf16>, vector<16x128xf32> -> vector<16x128xf32>
    %c0_65 = arith.constant 0 : index
    %c0_66 = arith.constant 0 : index
    %c0_67 = arith.constant 0 : index
    %199 = vector.load %arg13[%c0_65, %c0_66, %c0_67] : memref<1x1x128xf32, #tpu.memory_space<vmem>>, vector<1x1x128xf32>
    %200 = vector.shape_cast %199 : vector<1x1x128xf32> to vector<1x128xf32>
    %201 = vector.broadcast %200 : vector<1x128xf32> to vector<16x128xf32>
    %202 = arith.addf %198, %201 : vector<16x128xf32>
    %cst_68 = arith.constant 1.702000e+00 : f32
    %203 = vector.broadcast %cst_68 : f32 to vector<16x128xf32>
    %204 = arith.mulf %203, %202 : vector<16x128xf32>
    %205 = arith.negf %204 : vector<16x128xf32>
    %206 = math.exp %205 : vector<16x128xf32>
    %cst_69 = arith.constant 1.000000e+00 : f32
    %207 = vector.broadcast %cst_69 : f32 to vector<16x128xf32>
    %208 = arith.addf %207, %206 : vector<16x128xf32>
    %209 = arith.divf %207, %208 : vector<16x128xf32>
    %210 = arith.mulf %202, %209 : vector<16x128xf32>
    %211 = arith.truncf %210 : vector<16x128xf32> to vector<16x128xbf16>
    %c0_70 = arith.constant 0 : index
    %c0_71 = arith.constant 0 : index
    %c0_72 = arith.constant 0 : index
    %212 = vector.load %arg14[%c0_70, %c0_71, %c0_72] : memref<1x128x32xbf16, #tpu.memory_space<vmem>>, vector<1x128x32xbf16>
    %213 = vector.shape_cast %212 : vector<1x128x32xbf16> to vector<128x32xbf16>
    %cst_73 = arith.constant dense<0.000000e+00> : vector<16x32xf32>
    %214 = tpu.matmul %211, %213, %cst_73 {dimension_numbers = #tpu.dot_dimension_numbers<[1], [0], [0], [1], [0, 0, 1, 1], [], []>} : vector<16x128xbf16>, vector<128x32xbf16>, vector<16x32xf32> -> vector<16x32xf32>
    %c0_74 = arith.constant 0 : index
    %c0_75 = arith.constant 0 : index
    %c0_76 = arith.constant 0 : index
    %215 = vector.load %arg15[%c0_74, %c0_75, %c0_76] : memref<1x1x32xf32, #tpu.memory_space<vmem>>, vector<1x1x32xf32>
    %216 = vector.shape_cast %215 : vector<1x1x32xf32> to vector<1x32xf32>
    %217 = vector.broadcast %216 : vector<1x32xf32> to vector<16x32xf32>
    %218 = arith.addf %214, %217 : vector<16x32xf32>
    %219 = vector.shape_cast %218 : vector<16x32xf32> to vector<2x8x32xf32>
    %220 = arith.addf %165, %219 : vector<2x8x32xf32>
    %c0_77 = arith.constant 0 : index
    %c0_78 = arith.constant 0 : index
    %c0_79 = arith.constant 0 : index
    %221 = vector.load %arg20[%c0_77, %c0_78, %c0_79] : memref<2x8x32xf32, #tpu.memory_space<vmem>>, vector<2x8x32xf32>
    tpu.vector_store %arg20[%c0_77, %c0_78, %c0_79], %220 {strides = array<i32>} : memref<2x8x32xf32, #tpu.memory_space<vmem>>, vector<2x8x32xf32>,
    %c1_i32 = arith.constant 1 : i32
    %222 = arith.cmpi eq, %arg0, %c1_i32 : i32
    %223 = arith.extui %222 : i1 to i32
    %c0_i32_80 = arith.constant 0 : i32
    %224 = arith.cmpi ne, %223, %c0_i32_80 : i32
    scf.if %224 {
      %c0_81 = arith.constant 0 : index
      %225 = memref.load %arg1[%c0_81] : memref<2xi32, #tpu.memory_space<smem>>
      %c0_82 = arith.constant 0 : index
      %226 = arith.index_cast %225 : i32 to index
      %c0_83 = arith.constant 0 : index
      %227 = vector.load %arg20[%c0_82, %226, %c0_83] : memref<2x8x32xf32, #tpu.memory_space<vmem>>, vector<1x1x32xf32>
      %228 = vector.shape_cast %227 : vector<1x1x32xf32> to vector<1x32xf32>
      %c0_84 = arith.constant 0 : index
      %c0_85 = arith.constant 0 : index
      %229 = vector.load %arg16[%c0_84, %c0_85] : memref<1x32xf32, #tpu.memory_space<vmem>>, vector<1x32xf32>
      %c0_86 = arith.constant 0 : index
      %c0_87 = arith.constant 0 : index
      %230 = vector.load %arg17[%c0_86, %c0_87] : memref<1x32xf32, #tpu.memory_space<vmem>>, vector<1x32xf32>
      %cst_88 = arith.constant dense<0.000000e+00> : vector<1xf32>
      %231 = vector.multi_reduction <add>, %228, %cst_88 [1] : vector<1x32xf32> to vector<1xf32>
      %232 = vector.shape_cast %231 : vector<1xf32> to vector<1x1xf32>
      %cst_89 = arith.constant 3.200000e+01 : f32
      %233 = vector.broadcast %cst_89 : f32 to vector<1x1xf32>
      %234 = arith.divf %232, %233 : vector<1x1xf32>
      %235 = vector.broadcast %234 : vector<1x1xf32> to vector<1x32xf32>
      %236 = arith.subf %228, %235 : vector<1x32xf32>
      %237 = arith.mulf %236, %236 : vector<1x32xf32>
      %cst_90 = arith.constant dense<0.000000e+00> : vector<1xf32>
      %238 = vector.multi_reduction <add>, %237, %cst_90 [1] : vector<1x32xf32> to vector<1xf32>
      %239 = vector.shape_cast %238 : vector<1xf32> to vector<1x1xf32>
      %cst_91 = arith.constant 3.200000e+01 : f32
      %240 = vector.broadcast %cst_91 : f32 to vector<1x1xf32>
      %241 = arith.divf %239, %240 : vector<1x1xf32>
      %242 = vector.broadcast %234 : vector<1x1xf32> to vector<1x32xf32>
      %243 = arith.subf %228, %242 : vector<1x32xf32>
      %cst_92 = arith.constant 9.99999974E-6 : f32
      %244 = vector.broadcast %cst_92 : f32 to vector<1x1xf32>
      %245 = arith.addf %241, %244 : vector<1x1xf32>
      %246 = math.rsqrt %245 : vector<1x1xf32>
      %247 = vector.broadcast %246 : vector<1x1xf32> to vector<1x32xf32>
      %248 = arith.mulf %243, %247 : vector<1x32xf32>
      %249 = arith.mulf %248, %229 : vector<1x32xf32>
      %250 = arith.addf %249, %230 : vector<1x32xf32>
      %251 = arith.truncf %250 : vector<1x32xf32> to vector<1x32xbf16>
      %c0_93 = arith.constant 0 : index
      %c0_94 = arith.constant 0 : index
      %252 = vector.load %arg18[%c0_93, %c0_94] : memref<32x32xbf16, #tpu.memory_space<vmem>>, vector<32x32xbf16>
      %cst_95 = arith.constant dense<0.000000e+00> : vector<1x32xf32>
      %253 = tpu.matmul %251, %252, %cst_95 {dimension_numbers = #tpu.dot_dimension_numbers<[1], [0], [0], [1], [0, 0, 1, 1], [], []>} : vector<1x32xbf16>, vector<32x32xbf16>, vector<1x32xf32> -> vector<1x32xf32>
      %c0_96 = arith.constant 0 : index
      %c0_97 = arith.constant 0 : index
      %254 = vector.load %arg19[%c0_96, %c0_97] : memref<2x32xf32, #tpu.memory_space<vmem>>, vector<1x32xf32>
      tpu.vector_store %arg19[%c0_96, %c0_97], %253 {strides = array<i32>} : memref<2x32xf32, #tpu.memory_space<vmem>>, vector<1x32xf32>,
      %c1 = arith.constant 1 : index
      %255 = memref.load %arg1[%c1] : memref<2xi32, #tpu.memory_space<smem>>
      %c1_98 = arith.constant 1 : index
      %256 = arith.index_cast %255 : i32 to index
      %c0_99 = arith.constant 0 : index
      %257 = vector.load %arg20[%c1_98, %256, %c0_99] : memref<2x8x32xf32, #tpu.memory_space<vmem>>, vector<1x1x32xf32>
      %258 = vector.shape_cast %257 : vector<1x1x32xf32> to vector<1x32xf32>
      %c0_100 = arith.constant 0 : index
      %c0_101 = arith.constant 0 : index
      %259 = vector.load %arg16[%c0_100, %c0_101] : memref<1x32xf32, #tpu.memory_space<vmem>>, vector<1x32xf32>
      %c0_102 = arith.constant 0 : index
      %c0_103 = arith.constant 0 : index
      %260 = vector.load %arg17[%c0_102, %c0_103] : memref<1x32xf32, #tpu.memory_space<vmem>>, vector<1x32xf32>
      %cst_104 = arith.constant dense<0.000000e+00> : vector<1xf32>
      %261 = vector.multi_reduction <add>, %258, %cst_104 [1] : vector<1x32xf32> to vector<1xf32>
      %262 = vector.shape_cast %261 : vector<1xf32> to vector<1x1xf32>
      %cst_105 = arith.constant 3.200000e+01 : f32
      %263 = vector.broadcast %cst_105 : f32 to vector<1x1xf32>
      %264 = arith.divf %262, %263 : vector<1x1xf32>
      %265 = vector.broadcast %264 : vector<1x1xf32> to vector<1x32xf32>
      %266 = arith.subf %258, %265 : vector<1x32xf32>
      %267 = arith.mulf %266, %266 : vector<1x32xf32>
      %cst_106 = arith.constant dense<0.000000e+00> : vector<1xf32>
      %268 = vector.multi_reduction <add>, %267, %cst_106 [1] : vector<1x32xf32> to vector<1xf32>
      %269 = vector.shape_cast %268 : vector<1xf32> to vector<1x1xf32>
      %cst_107 = arith.constant 3.200000e+01 : f32
      %270 = vector.broadcast %cst_107 : f32 to vector<1x1xf32>
      %271 = arith.divf %269, %270 : vector<1x1xf32>
      %272 = vector.broadcast %264 : vector<1x1xf32> to vector<1x32xf32>
      %273 = arith.subf %258, %272 : vector<1x32xf32>
      %cst_108 = arith.constant 9.99999974E-6 : f32
      %274 = vector.broadcast %cst_108 : f32 to vector<1x1xf32>
      %275 = arith.addf %271, %274 : vector<1x1xf32>
      %276 = math.rsqrt %275 : vector<1x1xf32>
      %277 = vector.broadcast %276 : vector<1x1xf32> to vector<1x32xf32>
      %278 = arith.mulf %273, %277 : vector<1x32xf32>
      %279 = arith.mulf %278, %259 : vector<1x32xf32>
      %280 = arith.addf %279, %260 : vector<1x32xf32>
      %281 = arith.truncf %280 : vector<1x32xf32> to vector<1x32xbf16>
      %c0_109 = arith.constant 0 : index
      %c0_110 = arith.constant 0 : index
      %282 = vector.load %arg18[%c0_109, %c0_110] : memref<32x32xbf16, #tpu.memory_space<vmem>>, vector<32x32xbf16>
      %cst_111 = arith.constant dense<0.000000e+00> : vector<1x32xf32>
      %283 = tpu.matmul %281, %282, %cst_111 {dimension_numbers = #tpu.dot_dimension_numbers<[1], [0], [0], [1], [0, 0, 1, 1], [], []>} : vector<1x32xbf16>, vector<32x32xbf16>, vector<1x32xf32> -> vector<1x32xf32>
      %c1_112 = arith.constant 1 : index
      %c0_113 = arith.constant 0 : index
      %284 = vector.load %arg19[%c1_112, %c0_113] : memref<2x32xf32, #tpu.memory_space<vmem>>, vector<1x32xf32>
      tpu.vector_store %arg19[%c1_112, %c0_113], %283 {strides = array<i32>} : memref<2x32xf32, #tpu.memory_space<vmem>>, vector<1x32xf32>,
    } else {
    }
    return
  }
  func.func @transform_0(%arg0: i32, %arg1: memref<2xi32, #tpu.memory_space<smem>>) -> (i32, i32, i32) {
    %c0_i32 = arith.constant 0 : i32
    %c0_i32_0 = arith.constant 0 : i32
    %c0_i32_1 = arith.constant 0 : i32
    %c0_i32_2 = arith.constant 0 : i32
    return %c0_i32, %c0_i32_0, %c0_i32_1 : i32, i32, i32
  }
  func.func @transform_1(%arg0: i32, %arg1: memref<2xi32, #tpu.memory_space<smem>>) -> (i32, i32) {
    %c0_i32 = arith.constant 0 : i32
    %c0_i32_0 = arith.constant 0 : i32
    %c0_i32_1 = arith.constant 0 : i32
    return %c0_i32, %c0_i32_0 : i32, i32
  }
  func.func @transform_2(%arg0: i32, %arg1: memref<2xi32, #tpu.memory_space<smem>>) -> (i32, i32, i32) {
    %c0_i32 = arith.constant 0 : i32
    %c0_i32_0 = arith.constant 0 : i32
    %c0_i32_1 = arith.constant 0 : i32
    return %arg0, %c0_i32, %c0_i32_0 : i32, i32, i32
  }
  func.func @transform_3(%arg0: i32, %arg1: memref<2xi32, #tpu.memory_space<smem>>) -> (i32, i32, i32) {
    %c0_i32 = arith.constant 0 : i32
    %c0_i32_0 = arith.constant 0 : i32
    %c0_i32_1 = arith.constant 0 : i32
    return %arg0, %c0_i32, %c0_i32_0 : i32, i32, i32
  }
  func.func @transform_4(%arg0: i32, %arg1: memref<2xi32, #tpu.memory_space<smem>>) -> (i32, i32, i32) {
    %c0_i32 = arith.constant 0 : i32
    %c0_i32_0 = arith.constant 0 : i32
    %c0_i32_1 = arith.constant 0 : i32
    return %arg0, %c0_i32, %c0_i32_0 : i32, i32, i32
  }
  func.func @transform_5(%arg0: i32, %arg1: memref<2xi32, #tpu.memory_space<smem>>) -> (i32, i32, i32) {
    %c0_i32 = arith.constant 0 : i32
    %c0_i32_0 = arith.constant 0 : i32
    %c0_i32_1 = arith.constant 0 : i32
    return %arg0, %c0_i32, %c0_i32_0 : i32, i32, i32
  }
  func.func @transform_6(%arg0: i32, %arg1: memref<2xi32, #tpu.memory_space<smem>>) -> (i32, i32, i32) {
    %c0_i32 = arith.constant 0 : i32
    %c0_i32_0 = arith.constant 0 : i32
    %c0_i32_1 = arith.constant 0 : i32
    return %arg0, %c0_i32, %c0_i32_0 : i32, i32, i32
  }
  func.func @transform_7(%arg0: i32, %arg1: memref<2xi32, #tpu.memory_space<smem>>) -> (i32, i32, i32) {
    %c0_i32 = arith.constant 0 : i32
    %c0_i32_0 = arith.constant 0 : i32
    %c0_i32_1 = arith.constant 0 : i32
    return %arg0, %c0_i32, %c0_i32_0 : i32, i32, i32
  }
  func.func @transform_8(%arg0: i32, %arg1: memref<2xi32, #tpu.memory_space<smem>>) -> (i32, i32, i32) {
    %c0_i32 = arith.constant 0 : i32
    %c0_i32_0 = arith.constant 0 : i32
    %c0_i32_1 = arith.constant 0 : i32
    return %arg0, %c0_i32, %c0_i32_0 : i32, i32, i32
  }
  func.func @transform_9(%arg0: i32, %arg1: memref<2xi32, #tpu.memory_space<smem>>) -> (i32, i32, i32) {
    %c0_i32 = arith.constant 0 : i32
    %c0_i32_0 = arith.constant 0 : i32
    %c0_i32_1 = arith.constant 0 : i32
    return %arg0, %c0_i32, %c0_i32_0 : i32, i32, i32
  }
  func.func @transform_10(%arg0: i32, %arg1: memref<2xi32, #tpu.memory_space<smem>>) -> (i32, i32, i32) {
    %c0_i32 = arith.constant 0 : i32
    %c0_i32_0 = arith.constant 0 : i32
    %c0_i32_1 = arith.constant 0 : i32
    return %arg0, %c0_i32, %c0_i32_0 : i32, i32, i32
  }
  func.func @transform_11(%arg0: i32, %arg1: memref<2xi32, #tpu.memory_space<smem>>) -> (i32, i32, i32) {
    %c0_i32 = arith.constant 0 : i32
    %c0_i32_0 = arith.constant 0 : i32
    %c0_i32_1 = arith.constant 0 : i32
    return %arg0, %c0_i32, %c0_i32_0 : i32, i32, i32
  }
  func.func @transform_12(%arg0: i32, %arg1: memref<2xi32, #tpu.memory_space<smem>>) -> (i32, i32, i32) {
    %c0_i32 = arith.constant 0 : i32
    %c0_i32_0 = arith.constant 0 : i32
    %c0_i32_1 = arith.constant 0 : i32
    return %arg0, %c0_i32, %c0_i32_0 : i32, i32, i32
  }
  func.func @transform_13(%arg0: i32, %arg1: memref<2xi32, #tpu.memory_space<smem>>) -> (i32, i32, i32) {
    %c0_i32 = arith.constant 0 : i32
    %c0_i32_0 = arith.constant 0 : i32
    %c0_i32_1 = arith.constant 0 : i32
    return %arg0, %c0_i32, %c0_i32_0 : i32, i32, i32
  }
  func.func @transform_14(%arg0: i32, %arg1: memref<2xi32, #tpu.memory_space<smem>>) -> (i32, i32) {
    %c0_i32 = arith.constant 0 : i32
    %c0_i32_0 = arith.constant 0 : i32
    %c0_i32_1 = arith.constant 0 : i32
    return %c0_i32, %c0_i32_0 : i32, i32
  }
  func.func @transform_15(%arg0: i32, %arg1: memref<2xi32, #tpu.memory_space<smem>>) -> (i32, i32) {
    %c0_i32 = arith.constant 0 : i32
    %c0_i32_0 = arith.constant 0 : i32
    %c0_i32_1 = arith.constant 0 : i32
    return %c0_i32, %c0_i32_0 : i32, i32
  }
  func.func @transform_16(%arg0: i32, %arg1: memref<2xi32, #tpu.memory_space<smem>>) -> (i32, i32) {
    %c0_i32 = arith.constant 0 : i32
    %c0_i32_0 = arith.constant 0 : i32
    %c0_i32_1 = arith.constant 0 : i32
    return %c0_i32, %c0_i32_0 : i32, i32
  }
  func.func @transform_17(%arg0: i32, %arg1: memref<2xi32, #tpu.memory_space<smem>>) -> (i32, i32) {
    %c0_i32 = arith.constant 0 : i32
    %c0_i32_0 = arith.constant 0 : i32
    %c0_i32_1 = arith.constant 0 : i32
    return %c0_i32, %c0_i32_0 : i32, i32
  }
}

</mosaic_0001>

<bundles_post_ra>
// kernel: tpu_custom_call.1
= control target key start
LH: loop header
LB: loop body
LE: loop exit
PB: predicated region body
PF: predicated region fallthrough
CT: control target
= control target key end

     0   :  { %s3936_s0 = inlined_call_operand.vmem [shape: s32[2], index: 0, kind: input, shape index: {}]   ;;  %s3937_s1 = inlined_call_operand.vmem [shape: f32[2,8,32], index: 1, kind: input, shape index: {}]   ;;  %s3938_s2 = inlined_call_operand.vmem [shape: f32[8,32], index: 2, kind: input, shape index: {}]   ;;  %s3939_s3 = inlined_call_operand.vmem [shape: f32[2,1,32], index: 3, kind: input, shape index: {}]   ;;  %s3940_s4 = inlined_call_operand.vmem [shape: f32[2,1,32], index: 4, kind: input, shape index: {}]   ;;  %s3941_s5 = inlined_call_operand.vmem [shape: bf16[2,32,96], index: 5, kind: input, shape index: {}]   ;;  %s3942_s6 = inlined_call_operand.vmem [shape: f32[2,1,96], index: 6, kind: input, shape index: {}]   ;;  %s3943_s7 = inlined_call_operand.vmem [shape: bf16[2,32,32], index: 7, kind: input, shape index: {}]   ;;  %s3944_s8 = inlined_call_operand.vmem [shape: f32[2,1,32], index: 8, kind: input, shape index: {}]   ;;  %s3945_s9 = inlined_call_operand.vmem [shape: f32[2,1,32], index: 9, kind: input, shape index: {}]   ;;  %s3946_s10 = inlined_call_operand.vmem [shape: f32[2,1,32], index: 10, kind: input, shape index: {}]   ;;  %s3947_s11 = inlined_call_operand.vmem [shape: bf16[2,32,128], index: 11, kind: input, shape index: {}]   ;;  %s3948_s12 = inlined_call_operand.vmem [shape: f32[2,1,128], index: 12, kind: input, shape index: {}]   ;;  %s3949_s13 = inlined_call_operand.vmem [shape: bf16[2,128,32], index: 13, kind: input, shape index: {}]   ;;  %s3950_s14 = inlined_call_operand.vmem [shape: f32[2,1,32], index: 14, kind: input, shape index: {}]   ;;  %s3951_s15 = inlined_call_operand.vmem [shape: f32[1,32], index: 15, kind: input, shape index: {}]   ;;  %s3952_s16 = inlined_call_operand.vmem [shape: f32[1,32], index: 16, kind: input, shape index: {}]   ;;  %s3953_s17 = inlined_call_operand.vmem [shape: bf16[32,32], index: 17, kind: input, shape index: {}]   ;;  %s3954_s18 = inlined_call_operand.hbm [shape: f32[2,32], index: 18, kind: output, shape index: {}]  }
   0x1   :  { %3961 = sst [smem:[#allocation10_spill]] %s3936_s0 }
   0x2   :  { %3962 = sst [smem:[#allocation11_spill]] %s3937_s1  ;;  %s3971_s29 = sld [smem:[#allocation10_spill]] }
   0x3   :  { %3963 = sst [smem:[#allocation12_spill]] %s3938_s2 }
   0x4   :  { %3964 = sst [smem:[#allocation13_spill]] %s3941_s5 }
   0x5   :  { %3965 = sst [smem:[#allocation14_spill]] %s3943_s7 }
   0x6   :  { %3966 = sst [smem:[#allocation15_spill]] %s3948_s12 }
   0x7   :  { %3967 = sst [smem:[#allocation16_spill]] %s3951_s15 }
   0x8   :  { %3968 = sst [smem:[#allocation17_spill]] %s3952_s16  ;;  %s23_s12 = sshll.u32 %s3971_s29, 4  ;;  %s24_s12 = int_to_ptr.vmem [resolvable:$true] %s23_s12 }
   0x9   :  { %3969 = sst [smem:[#allocation18_spill]] %s3953_s17  ;;  %s3352_s30 = scalar_lea.vmem %s24_s12, 16 }
   0xa   :  { %3970 = sst [smem:[#allocation19_spill]] %s3954_s18  ;;  %p3353_p0 = scmp.ne.s32.totalorder %s24_s12, %s3352_s30 }
   0xb   :  { %p3357_p1 = scmp.lt.s32.totalorder %s24_s12, %s24_s12  ;;  %p3358_p2 = scmp.lt.s32.totalorder %s3352_s30, %s3352_s30 }
   0xd   :  { %p3359_p3 = por %p3358_p2, %p3357_p1 }
   0xf   :  { %p3360_p4 = pnand %p3359_p3, %p3353_p0 }
  0x11   :  { %3363 = shalt.err (!%p3360_p4)  }
  0x12   :  { %s3404_s0 = smov [#allocation4]  }
  0x13   :  { %26 = dma.vmem_to_smem %s24_s12, 16, %s3404_s0, [#allocation3] }
  0x14   :  { %3394 = dma.done.wait [#allocation3], 16 }
  0x15   :  { %3395 = vsyncadd [#allocation3], 4294967280 }
  0x16   :  { %28 = sfence }
  0x17   :  { %29 = vsyncpa [#allocation6], 0  ;;  %s3519_s19 = smov 0  }
  0x18 LB: > { %3972 = sst [smem:[#allocation9_spill]] %s3402_s19  ;;  %s3525_s1 = sadd.s32 4294967295, %s3402_s19   ;;  %s3402_s19 = sphi %s3519_s19, %s35_s19  }
  0x19   : > { %p2957_p5 = scmp.ge.s32.totalorder %s3402_s19, 1  ;;  %p584_p6 = scmp.lt.s32.totalorder %s3402_s19, 3 }
  0x1b   : > { %p585_p7 = pnand %p2957_p5, %p584_p6 }
  0x1c   : > { %p670_p8 = scmp.lt.s32.totalorder (!%p585_p7), %s3525_s1, 1  ;;  %s3973_s5 = sld [smem:[#allocation13_spill]] (!%p585_p7) }
  0x1d   : > { %588 = sbr.rel (%p585_p7) target bundleno = 4863 (0x12ff), region = 88  ;;  %s3974_s7 = sld [smem:[#allocation14_spill]] (!%p585_p7) }
  0x1e   : > { %p2966_p9 = scmp.ne.s32.totalorder (!%p585_p7), %s3525_s1, 0 }
  0x24   : > { %s3531_s12 = scalar_select %p670_p8, %s3525_s1, 1 }
  0x25   : > { %s3976_s29 = sld [smem:[#allocation11_spill]] (!%p2966_p9)  ;;  %vm724_vm0 = vcmask (!%p2966_p9), 261120  }
  0x26   : > { %s3032_s25 = sshll.u32 %s3531_s12, 4  ;;  %s694_s16 = scalar_lea.vmem %s3945_s9, %s3531_s12 }
  0x27   : > { %s3549_s0 = scalar_lea.vmem %s3973_s5, %s3032_s25  ;;  %s3554_s19 = scalar_lea.vmem %s3974_s7, %s3032_s25 }
  0x28   : > { %s697_s28 = scalar_lea.vmem %s3946_s10, %s3531_s12  ;;  %s3571_s5 = scalar_lea.vmem %s3947_s11, %s3032_s25 }
  0x29   : > { %s3975_s7 = sld [smem:[#allocation15_spill]]  ;;  %s3035_s17 = sshll.u32 %s3531_s12, 6 }
  0x2a   : > { %s3581_s2 = scalar_lea.vmem %s3949_s13, %s3035_s17  ;;  %s713_s26 = scalar_lea.vmem %s3950_s14, %s3531_s12 }
  0x2b   : > { %718 = sbr.rel (%p2966_p9) target bundleno = 57 (0x39), region = 92  ;;  %v719_v0 = vld [vmem:[%s3976_s29] sm:$0xff] (!%p2966_p9)  ;;  %v720_v2 = vld [vmem:[%s3976_s29 + $0x8] sm:$0xff] (!%p2966_p9) }
  0x2f   : > { %s705_s15 = scalar_lea.vmem %s3975_s7, %s3531_s12  ;;  %s3977_s7 = sld [smem:[#allocation12_spill]] (!%p2966_p9) }
  0x35   : > { %v721_v1 = vld [vmem:[%s3977_s7] sm:$0xff] }
  0x36   : > { %v722_v3 = vadd.f32 %v721_v1, %v719_v0  ;;  %v723_v4 = vadd.f32 %v721_v1, %v720_v2 }
  0x38   : > { %725 = vst.msk [vmem:[#allocation2] sm:$0xff] %vm724_vm0, %v722_v3  ;;  %726 = vst.msk [vmem:[#allocation2 + $0x8] sm:$0xff] %vm724_vm0, %v723_v4 }
  0x39 PF: > { %vm731_vm1 = vcmask 261120   ;;  %v3284_v19 = vld [vmem:[%s3549_s0] sm:$0xff]   ;;  %v3405_v20 = vmov 0.0   ;;  %v3285_v21 = vld [vmem:[%s3549_s0 + $0x8] sm:$0xff]   ;;  %vm3406_vm2 = vmmov 0   ;;  %s3978_s22 = scalar_lea.vmem %s3939_s3, %s3531_s12  ;;  %s3979_s27 = scalar_lea.vmem %s3940_s4, %s3531_s12  ;;  %vm858_vm3 = vcmask 64512  }
  0x3a   : > { %3097 = vmatprep.subr.bf16.mxu0 %v3405_v20  ;;  %3110 = vmatprep.subr.mxu1 %v3405_v20  ;;  %v2967_v30 = vld [vmem:[%s3978_s22] ss:$0 sm:$0xff]  ;;  %s3980_s20 = scalar_lea.vmem %s3942_s6, %s3531_s12  ;;  %s3407_s7 = smov 96   ;;  %v845_v50 = vlaneseq  ;;  %vm1521_vm5 = vcmask 1043456  }
  0x3b   : > { %3098 = vmatpush3.bf16.msra.mxu0 %v3284_v19  ;;  %3101 = vmatprep.mubr.msk.bf16.mxu0 %vm3406_vm2, %v3405_v20  ;;  %v2968_v34 = vld [vmem:[%s3979_s27] ss:$0 sm:$0xff]  ;;  %s3408_s21 = smov 64   ;;  %s3409_s18 = smov 88  }
  0x3c   : > { %3099 = vmatprep.subr.bf16.mxu0 %v3405_v20  ;;  %3112 = vmatprep.mubr.msk.f32.mxu1 %vm3406_vm2, %v3405_v20  ;;  %v2969_v39 = vld [vmem:[%s3980_s20] ss:$0 sm:$0xff]  ;;  %v846_v51 = vshrl.u32 %v845_v50, 7  ;;  %v848_v52 = vand.u32 127, %v845_v50  ;;  %s3410_s17 = smov 120   ;;  %s3411_s0 = smov 56  }
  0x3d   : > { %s3412_s22 = smov 80   ;;  %s3413_s24 = smov 112  }
  0x3e   : > { %vm849_vm4 = vcmp.gt.s32.totalorder %v848_v52, %v846_v51  ;;  %s3414_s23 = smov 72   ;;  %s3415_s27 = smov 48  }
  0x3f   : > { %v3597_v5 = vld [vmem:[#allocation2] sm:$0xff]  ;;  %v3599_v6 = vld [vmem:[#allocation2 + $0x8] sm:$0xff]  ;;  %3100 = vmatpush3.bf16.msra.mxu0 %v3285_v21  ;;  %v3662_v53 = vsel %vm849_vm4, -1e+09, %v3405_v20  ;;  %s3416_s25 = smov 104   ;;  %s3417_s30 = smov 40  }
  0x40   : > { %v732_v7 = vsel %vm731_vm1, %v3597_v5, 0.0  ;;  %v735_v8 = vsel %vm731_vm1, %v3599_v6, 0.0  ;;  %3105 = vmatprep.subr.mxu0 %v3405_v20  ;;  %p3019_p10 = scmp.ne.s32.totalorder %s3525_s1, 1 }
  0x41   : > { %733 = vadd.xlane.f32.xlu0 %v732_v7  ;;  %vm2638_vm6 = vcmask (!%p3019_p10), 253952   ;;  %vm3419_vm7 = vmmov (!%p3019_p10), 0  }
  0x45   : > { %736 = vadd.xlane.f32.xlu0 %v735_v8 }
  0xce   : > { %v734_v9 = vpop.xlane.xlu0 %733 }
  0xcf   : > { %v739_v10 = vmul.f32 0.03125, %v734_v9 }
  0xd1   : > { %v741_v11 = vsub.f32 %v3597_v5, %v739_v10 }
  0xd2   : > { %v737_v12 = vpop.xlane.xlu0 %736 }
  0xd3   : > { %v740_v13 = vmul.f32 0.03125, %v737_v12  ;;  %v743_v14 = vmul.f32 %v741_v11, %v741_v11 }
  0xd5   : > { %v742_v15 = vsub.f32 %v3599_v6, %v740_v13  ;;  %v745_v16 = vsel %vm731_vm1, %v743_v14, 0.0 }
  0xd6   : > { %746 = vadd.xlane.f32.xlu1 %v745_v16 }
  0xd7   : > { %v744_v17 = vmul.f32 %v742_v15, %v742_v15 }
  0xd9   : > { %v748_v18 = vsel %vm731_vm1, %v744_v17, 0.0 }
  0xda   : > { %749 = vadd.xlane.f32.xlu1 %v748_v18 }
 0x163   : > { %v747_v22 = vpop.xlane.xlu1 %746 }
 0x164   : > { %v751_v23 = vmul.f32 0.03125, %v747_v22 }
 0x166   : > { %v753_v24 = vadd.f32 1e-05, %v751_v23 }
 0x167   : > { %v750_v25 = vpop.xlane.xlu1 %749 }
 0x168   : > { %3296 = vrsqrt.f32 %v753_v24  ;;  %v752_v26 = vmul.f32 0.03125, %v750_v25 }
 0x16a   : > { %v754_v27 = vadd.f32 1e-05, %v752_v26 }
 0x16c   : > { %3298 = vrsqrt.f32 %v754_v27 }
 0x172   : > { %v3297_v28 = vpop.eup %3296 }
 0x173   : > { %v757_v29 = vmul.f32 %v3297_v28, %v741_v11 }
 0x175   : > { %v765_v33 = vmul.f32 %v2967_v30, %v757_v29 }
 0x176   : > { %v3299_v31 = vpop.eup %3298 }
 0x177   : > { %v758_v32 = vmul.f32 %v3299_v31, %v742_v15  ;;  %v773_v36 = vadd.f32 %v2968_v34, %v765_v33 }
 0x179   : > { %v766_v35 = vmul.f32 %v2967_v30, %v758_v32 }
 0x17b   : > { %v774_v37 = vadd.f32 %v2968_v34, %v766_v35 }
 0x17d   : > { %v775_v38 = vpack.c.bf16 %v774_v37, %v773_v36 }
 0x17f   : > { %3102 = vmatmul.mubr.msk.bf16.vlgmr.msra.gmra.mrb[0].mxu0 %vm731_vm1, %v775_v38 }
 0x180   : > { %3107 = vmatprep.mubr.msk.f32.mxu0 %vm3406_vm2, %v3405_v20 }
 0x252   : > { %v836_v40 = vpop.f32.mrb[0].mxu0 }
 0x253   : > { %v3637_v41 = vadd.f32 %v2969_v39, %v836_v40  ;;  %v3103_v42 = vpop.f32.mrb[1].mxu0 }
 0x254   : > { %v839_v43 = vpop.f32.mrb[2].mxu0 }
 0x255   : > { %v3639_v44 = vadd.f32 %v2969_v39, %v839_v43  ;;  %856 = vrot.lane.b32.xlu0 %v3637_v41, %s3407_s7  ;;  %v3104_v45 = vpop.f32.mrb[3].mxu0  ;;  %v3645_v48 = vmul.f32 0.35355338, %v3637_v41 }
 0x257   : > { %935 = vrot.lane.b32.xlu1 %v3639_v44, %s3407_s7  ;;  %v3652_v49 = vmul.f32 0.35355338, %v3639_v44  ;;  %s3981_s7 = scalar_lea.vmem %s3944_s8, %s3531_s12  ;;  %s3023_s12 = sld [smem:[#allocation4 + $0x1]] (!%p3019_p10) }
 0x2c7   : > { %v857_v46 = vpop.permute.xlu0 %856 }
 0x2c8   : > { %3106 = vmatpush3.xpose.msk.msra.mxu0 %vm858_vm3, %v857_v46 }
 0x2c9   : > { %v936_v47 = vpop.permute.xlu1 %935  ;;  %3120 = vmatprep.subr.mxu0 %v3405_v20 }
 0x2ca   : > { %3111 = vmatpush3.xpose.msk.msra.mxu1 %vm858_vm3, %v936_v47 }
 0x2cb   : > { %3108 = vmatmul.mubr.msk.f32.vlgmr.msra.gmra.mrb[4].mxu0 %vm858_vm3, %v3645_v48  ;;  %3115 = vmatprep.subr.mxu1 %v3405_v20 }
 0x2cc   : > { %3122 = vmatprep.mubr.msk.f32.mxu0 %vm3406_vm2, %v3405_v20 }
 0x2cd   : > { %3113 = vmatmul.mubr.msk.f32.vlgmr.msra.gmra.mrb[0].mxu1 %vm858_vm3, %v3652_v49 }
 0x2ce   : > { %3117 = vmatprep.mubr.msk.f32.mxu1 %vm3406_vm2, %v3405_v20 }
 0x39e   : > { %v930_v54 = vpop.f32.mrb[4].mxu0 }
 0x39f   : > { %v931_v55 = vadd.f32 %v930_v54, %v3662_v53  ;;  %v3109_v56 = vpop.f32.mrb[5].mxu0 }
 0x3a0   : > { %v1008_v57 = vpop.f32.mrb[0].mxu1 }
 0x3a1   : > { %v1009_v58 = vadd.f32 %v1008_v57, %v3662_v53  ;;  %v3114_v59 = vpop.f32.mrb[1].mxu1  ;;  %v1012_v60 = vsel %vm858_vm3, %v931_v55, -inf }
 0x3a2   : > { %1013 = vmax.xlane.f32.xlu1 %v1012_v60 }
 0x3a3   : > { %v1015_v61 = vsel %vm858_vm3, %v1009_v58, -inf }
 0x3a4   : > { %1016 = vmax.xlane.f32.xlu0 %v1015_v61 }
 0x3b3   : > { %1110 = vrot.lane.b32.xlu1 %v3639_v44, %s3408_s21 }
 0x3b7   : > { %1189 = vrot.lane.b32.xlu1 %v3637_v41, %s3409_s18 }
 0x3ba   : > { %1034 = vrot.lane.b32.xlu0 %v3637_v41, %s3408_s21 }
 0x3bb   : > { %1267 = vrot.lane.b32.xlu1 %v3639_v44, %s3409_s18 }
 0x42f   : > { %v1014_v62 = vpop.xlane.xlu1 %1013 }
 0x430   : > { %v1018_v63 = vsub.f32 %v931_v55, %v1014_v62 }
 0x431   : > { %v1017_v0 = vpop.xlane.xlu0 %1016 }
 0x432   : > { %v1020_v1 = vmul.f32 1.442695, %v1018_v63  ;;  %v1019_v2 = vsub.f32 %v1009_v58, %v1017_v0  ;;  %v852_v63 = vld [vmem:[%s3554_s19 + $0x4] sm:$0xf] }
 0x433   : > { %v1111_v3 = vpop.permute.xlu1 %1110  ;;  %v1523_v0 = vsel %vm1521_vm5, %v852_v63, 0 }
 0x434   : > { %3300 = vpow2.f32 %v1020_v1  ;;  %v1022_v4 = vmul.f32 1.442695, %v1019_v2  ;;  %3121 = vmatpush3.msra.mxu0 %v1111_v3  ;;  %v851_v3 = vld [vmem:[%s3554_s19] sm:$0xf] }
 0x435   : > { %v1035_v7 = vpop.permute.xlu0 %1034  ;;  %3130 = vmatprep.subr.mxu0 %v3405_v20 }
 0x436   : > { %3302 = vpow2.f32 %v1022_v4  ;;  %3116 = vmatpush3.msra.mxu1 %v1035_v7 }
 0x437   : > { %3125 = vmatprep.subr.mxu1 %v3405_v20  ;;  %v1190_v12 = vpop.permute.xlu1 %1189 }
 0x43b   : > { %v1268_v13 = vpop.permute.xlu1 %1267 }
 0x43e   : > { %v3301_v8 = vpop.eup %3300 }
 0x43f   : > { %v1024_v9 = vsel %vm858_vm3, %v3301_v8, 0.0 }
 0x440   : > { %v3303_v10 = vpop.eup %3302  ;;  %1025 = vadd.xlane.f32.xlu0 %v1024_v9 }
 0x441   : > { %v1027_v11 = vsel %vm858_vm3, %v3303_v10, 0.0 }
 0x442   : > { %1028 = vadd.xlane.f32.xlu1 %v1027_v11 }
 0x453   : > { %1265 = vrot.lane.b32.xlu1 %v3652_v49, %s3410_s17 }
 0x456   : > { %1187 = vrot.lane.b32.xlu0 %v3645_v48, %s3410_s17 }
 0x4cd   : > { %v1026_v14 = vpop.xlane.xlu0 %1025 }
 0x4ce   : > { %3304 = vrcp.f32 %v1026_v14 }
 0x4cf   : > { %v1029_v15 = vpop.xlane.xlu1 %1028 }
 0x4d0   : > { %3306 = vrcp.f32 %v1029_v15 }
 0x4d1   : > { %v1188_v21 = vpop.permute.xlu0 %1187 }
 0x4d3   : > { %v1266_v22 = vpop.permute.xlu1 %1265 }
 0x4d8   : > { %v3305_v16 = vpop.eup %3304 }
 0x4d9   : > { %v1032_v17 = vmul.f32 %v3305_v16, %v3301_v8 }
 0x4da   : > { %v3307_v18 = vpop.eup %3306 }
 0x4db   : > { %v1033_v19 = vmul.f32 %v3307_v18, %v3303_v10  ;;  %3118 = vmatmul.mubr.msk.f32.vlgmr.msra.gmra.mrb[2].mxu1 %vm858_vm3, %v1032_v17  ;;  %v1570_v10 = vsel %vm1521_vm5, %v851_v3, 0 }
 0x4dc   : > { %3126 = vmatpush3.xpose.msk.msra.mxu1 %vm858_vm3, %v1190_v12  ;;  %3127 = vmatprep.mubr.msk.f32.mxu1 %vm3406_vm2, %v3405_v20 }
 0x4dd   : > { %3123 = vmatmul.mubr.msk.f32.vlgmr.msra.gmra.mrb[6].mxu0 %vm858_vm3, %v1033_v19  ;;  %3135 = vmatprep.subr.mxu1 %v3405_v20 }
 0x4de   : > { %3131 = vmatpush3.xpose.msk.msra.mxu0 %vm858_vm3, %v1268_v13  ;;  %3132 = vmatprep.mubr.msk.f32.mxu0 %vm3406_vm2, %v3405_v20 }
 0x4df   : > { %3128 = vmatmul.mubr.msk.f32.vlgmr.msra.gmra.mrb[4].mxu1 %vm858_vm3, %v1188_v21  ;;  %3140 = vmatprep.subr.mxu0 %v3405_v20 }
 0x4e0   : > { %3137 = vmatprep.mubr.msk.f32.mxu1 %vm3406_vm2, %v3405_v20 }
 0x4e1   : > { %3133 = vmatmul.mubr.msk.f32.vlgmr.msra.gmra.mrb[8].mxu0 %vm858_vm3, %v1266_v22 }
 0x4e2   : > { %3142 = vmatprep.mubr.msk.f32.mxu0 %vm3406_vm2, %v3405_v20 }
 0x5ae   : > { %v3694_v23 = vpop.f32.mrb[2].mxu1 }
 0x5af   : > { %v3119_v24 = vpop.f32.mrb[3].mxu1 }
 0x5b0   : > { %v3696_v25 = vpop.f32.mrb[6].mxu0 }
 0x5b1   : > { %v1186_v26 = vpack.c.bf16 %v3696_v25, %v3694_v23  ;;  %v3124_v27 = vpop.f32.mrb[7].mxu0 }
 0x5b2   : > { %v1261_v28 = vpop.f32.mrb[4].mxu1 }
 0x5b3   : > { %v1262_v29 = vadd.f32 %v1261_v28, %v3662_v53  ;;  %v3129_v30 = vpop.f32.mrb[5].mxu1 }
 0x5b4   : > { %v1339_v31 = vpop.f32.mrb[8].mxu0 }
 0x5b5   : > { %v1340_v32 = vadd.f32 %v1339_v31, %v3662_v53  ;;  %v3134_v33 = vpop.f32.mrb[9].mxu0  ;;  %v1343_v34 = vsel %vm858_vm3, %v1262_v29, -inf }
 0x5b6   : > { %1344 = vmax.xlane.f32.xlu0 %v1343_v34 }
 0x5b7   : > { %v1346_v35 = vsel %vm858_vm3, %v1340_v32, -inf }
 0x5b8   : > { %1347 = vmax.xlane.f32.xlu1 %v1346_v35 }
 0x5c9   : > { %1441 = vrot.lane.b32.xlu1 %v3639_v44, %s3411_s0 }
 0x5cd   : > { %1693 = vrot.lane.b32.xlu1 %v3639_v44, %s3412_s22 }
 0x5d1   : > { %1691 = vrot.lane.b32.xlu1 %v3652_v49, %s3413_s24 }
 0x5d5   : > { %1613 = vrot.lane.b32.xlu1 %v3645_v48, %s3413_s24  ;;  %s2869_s24 = scalar_lea.vmem (!%p3019_p10), [#allocation2], %s3023_s12 }
 0x5d9   : > { %1995 = vrot.lane.b32.xlu1 %v3637_v41, %s3414_s23 }
 0x643   : > { %v1345_v36 = vpop.xlane.xlu0 %1344 }
 0x644   : > { %v1349_v37 = vsub.f32 %v1262_v29, %v1345_v36 }
 0x645   : > { %v1348_v38 = vpop.xlane.xlu1 %1347 }
 0x646   : > { %v1351_v39 = vmul.f32 1.442695, %v1349_v37  ;;  %v1350_v40 = vsub.f32 %v1340_v32, %v1348_v38 }
 0x648   : > { %3308 = vpow2.f32 %v1351_v39  ;;  %v1353_v42 = vmul.f32 1.442695, %v1350_v40 }
 0x649   : > { %v1442_v43 = vpop.permute.xlu1 %1441 }
 0x64a   : > { %3310 = vpow2.f32 %v1353_v42  ;;  %3141 = vmatpush3.msra.mxu0 %v1442_v43 }
 0x64b   : > { %3145 = vmatprep.subr.bf16.mxu0 %v3405_v20 }
 0x64d   : > { %v1694_v54 = vpop.permute.xlu1 %1693 }
 0x651   : > { %v1692_v57 = vpop.permute.xlu1 %1691 }
 0x652   : > { %v3309_v45 = vpop.eup %3308 }
 0x653   : > { %v1355_v46 = vsel %vm858_vm3, %v3309_v45, 0.0 }
 0x654   : > { %v3311_v47 = vpop.eup %3310  ;;  %1356 = vadd.xlane.f32.xlu0 %v1355_v46 }
 0x655   : > { %v1358_v50 = vsel %vm858_vm3, %v3311_v47, 0.0  ;;  %v1614_v62 = vpop.permute.xlu1 %1613 }
 0x658   : > { %1359 = vadd.xlane.f32.xlu0 %v1358_v50 }
 0x66e   : > { %1365 = vrot.lane.b32.xlu0 %v3637_v41, %s3411_s0 }
 0x672   : > { %1615 = vrot.lane.b32.xlu0 %v3637_v41, %s3412_s22  ;;  %s2633_s22 = sld [smem:[#allocation4]] (!%p3019_p10) }
 0x6e1   : > { %v1357_v51 = vpop.xlane.xlu0 %1356 }
 0x6e2   : > { %3312 = vrcp.f32 %v1357_v51 }
 0x6e5   : > { %v1360_v52 = vpop.xlane.xlu0 %1359 }
 0x6e6   : > { %3314 = vrcp.f32 %v1360_v52 }
 0x6e9   : > { %v1366_v55 = vpop.permute.xlu0 %1365 }
 0x6ea   : > { %3136 = vmatpush3.msra.mxu1 %v1366_v55 }
 0x6eb   : > { %3157 = vmatprep.subr.mxu1 %v3405_v20 }
 0x6ec   : > { %v3313_v56 = vpop.eup %3312 }
 0x6ed   : > { %v1363_v58 = vmul.f32 %v3313_v56, %v3309_v45  ;;  %v1616_v60 = vpop.permute.xlu0 %1615 }
 0x6ef   : > { %3138 = vmatmul.mubr.msk.f32.vlgmr.msra.gmra.mrb[6].mxu1 %vm858_vm3, %v1363_v58 }
 0x6f0   : > { %v3315_v59 = vpop.eup %3314  ;;  %3159 = vmatprep.mubr.msk.f32.mxu1 %vm3406_vm2, %v3405_v20 }
 0x6f1   : > { %v1364_v61 = vmul.f32 %v3315_v59, %v3311_v47  ;;  %3158 = vmatpush3.xpose.msk.msra.mxu1 %vm858_vm3, %v1616_v60 }
 0x6f2   : > { %3167 = vmatprep.subr.mxu1 %v3405_v20 }
 0x6f3   : > { %3143 = vmatmul.mubr.msk.f32.vlgmr.msra.gmra.mrb[10].mxu0 %vm858_vm3, %v1364_v61 }
 0x6f4   : > { %3160 = vmatmul.mubr.msk.f32.vlgmr.msra.gmra.mrb[8].mxu1 %vm858_vm3, %v1614_v62  ;;  %3147 = vmatprep.mubr.msk.bf16.mxu0 %vm3406_vm2, %v3405_v20 }
 0x6f5   : > { %3169 = vmatprep.mubr.msk.f32.mxu1 %vm3406_vm2, %v3405_v20  ;;  %3146 = vmatpush3.bf16.msra.mxu0 %v1523_v0  ;;  %v853_v0 = vld [vmem:[%s3554_s19 + $0x8] sm:$0xf] }
 0x6f6   : > { %3151 = vmatprep.subr.bf16.mxu0 %v3405_v20 }
 0x7c2   : > { %v1437_v1 = vpop.f32.mrb[6].mxu1 }
 0x7c3   : > { %v3139_v2 = vpop.f32.mrb[7].mxu1 }
 0x7c6   : > { %v1513_v4 = vpop.f32.mrb[10].mxu0 }
 0x7c7   : > { %v1517_v7 = vpack.c.bf16 %v1513_v4, %v1437_v1  ;;  %v3144_v8 = vpop.f32.mrb[11].mxu0  ;;  %v1687_v9 = vpop.f32.mrb[8].mxu1  ;;  %v1948_v1 = vsel %vm1521_vm5, %v853_v0, 0 }
 0x7c8   : > { %v3161_v11 = vpop.f32.mrb[9].mxu1  ;;  %v1688_v33 = vadd.f32 %v1687_v9, %v3662_v53 }
 0x7c9   : > { %3148 = vmatmul.mubr.msk.bf16.vlgmr.msra.gmra.mrb[12].mxu0 %vm858_vm3, %v1517_v7 }
 0x7ca   : > { %3152 = vmatpush3.bf16.msra.mxu0 %v1570_v10  ;;  %3153 = vmatprep.mubr.msk.bf16.mxu0 %vm3406_vm2, %v3405_v20 }
 0x7cb   : > { %3162 = vmatprep.subr.mxu0 %v3405_v20 }
 0x7d1   : > { %3154 = vmatmul.mubr.msk.bf16.vlgmr.msra.gmra.mrb[16].mxu0 %vm858_vm3, %v1186_v26 }
 0x7d2   : > { %3164 = vmatprep.mubr.msk.f32.mxu0 %vm3406_vm2, %v3405_v20 }
 0x7d3   : > { %3163 = vmatpush3.xpose.msk.msra.mxu0 %vm858_vm3, %v1694_v54 }
 0x7d4   : > { %3172 = vmatprep.subr.mxu0 %v3405_v20 }
 0x7d9   : > { %3165 = vmatmul.mubr.msk.f32.vlgmr.msra.gmra.mrb[20].mxu0 %vm858_vm3, %v1692_v57 }
 0x7da   : > { %3174 = vmatprep.mubr.msk.f32.mxu0 %vm3406_vm2, %v3405_v20 }
 0x89c   : > { %v1559_v12 = vpop.f32.mrb[12].mxu0 }
 0x89d   : > { %v3149_v13 = vpop.f32.mrb[13].mxu0 }
 0x89e   : > { %v1562_v14 = vpop.f32.mrb[14].mxu0 }
 0x89f   : > { %v3150_v15 = vpop.f32.mrb[15].mxu0 }
 0x8a4   : > { %v1606_v16 = vpop.f32.mrb[16].mxu0 }
 0x8a5   : > { %v3747_v17 = vadd.f32 %v1606_v16, %v1559_v12  ;;  %v3155_v18 = vpop.f32.mrb[17].mxu0 }
 0x8a6   : > { %v1609_v19 = vpop.f32.mrb[18].mxu0 }
 0x8a7   : > { %v3749_v21 = vadd.f32 %v1609_v19, %v1562_v14  ;;  %v3156_v22 = vpop.f32.mrb[19].mxu0 }
 0x8ac   : > { %v1765_v23 = vpop.f32.mrb[20].mxu0 }
 0x8ad   : > { %v1766_v24 = vadd.f32 %v1765_v23, %v3662_v53  ;;  %v3166_v25 = vpop.f32.mrb[21].mxu0 }
 0x8ae   : > { %v854_v25 = vld [vmem:[%s3554_s19 + $0xc] sm:$0xf] }
 0x8af   : > { %v1772_v26 = vsel %vm858_vm3, %v1766_v24, -inf }
 0x8b0   : > { %1773 = vmax.xlane.f32.xlu0 %v1772_v26  ;;  %v2328_v26 = vsel %vm1521_vm5, %v854_v25, 0  ;;  %v3004_v25 = vld [vmem:[%s705_s15] ss:$0 sm:$0xff]  ;;  %s3985_s15 = sld [smem:[#allocation17_spill]] (!%p3019_p10) }
 0x8c6   : > { %1867 = vrot.lane.b32.xlu0 %v3639_v44, %s3415_s27 }
 0x8ca   : > { %1993 = vrot.lane.b32.xlu0 %v3645_v48, %s3416_s25  ;;  %v1769_v48 = vsel %vm858_vm3, %v1688_v33, -inf }
 0x8ce   : > { %2071 = vrot.lane.b32.xlu0 %v3652_v49, %s3416_s25  ;;  %v1996_v49 = vpop.permute.xlu1 %1995  ;;  %s3983_s25 = sld [smem:[#allocation18_spill]] (!%p3019_p10) }
 0x93d   : > { %v1774_v27 = vpop.xlane.xlu0 %1773 }
 0x93e   : > { %v1776_v28 = vsub.f32 %v1766_v24, %v1774_v27 }
 0x940   : > { %v1779_v29 = vmul.f32 1.442695, %v1776_v28 }
 0x941   : > { %v1868_v30 = vpop.permute.xlu0 %1867 }
 0x942   : > { %3316 = vpow2.f32 %v1779_v29  ;;  %3173 = vmatpush3.msra.mxu0 %v1868_v30 }
 0x943   : > { %3183 = vmatprep.subr.mxu0 %v3405_v20 }
 0x945   : > { %v1994_v37 = vpop.permute.xlu0 %1993 }
 0x949   : > { %v2072_v39 = vpop.permute.xlu0 %2071 }
 0x94c   : > { %v3317_v31 = vpop.eup %3316 }
 0x94d   : > { %v1784_v32 = vsel %vm858_vm3, %v3317_v31, 0.0 }
 0x94e   : > { %1785 = vadd.xlane.f32.xlu1 %v1784_v32 }
 0x95f   : > { %2073 = vrot.lane.b32.xlu1 %v3639_v44, %s3414_s23 }
 0x983   : > { %1770 = vmax.xlane.f32.xlu1 %v1769_v48 }
 0x9db   : > { %v1786_v34 = vpop.xlane.xlu1 %1785 }
 0x9dc   : > { %3318 = vrcp.f32 %v1786_v34 }
 0x9df   : > { %v2074_v38 = vpop.permute.xlu1 %2073 }
 0x9e6   : > { %v3319_v35 = vpop.eup %3318 }
 0x9e7   : > { %v1790_v36 = vmul.f32 %v3319_v35, %v3317_v31 }
 0x9e9   : > { %3175 = vmatmul.mubr.msk.f32.vlgmr.msra.gmra.mrb[22].mxu0 %vm858_vm3, %v1790_v36 }
 0x9ea   : > { %3184 = vmatpush3.xpose.msk.msra.mxu0 %vm858_vm3, %v1996_v49  ;;  %3185 = vmatprep.mubr.msk.f32.mxu0 %vm3406_vm2, %v3405_v20 }
 0x9eb   : > { %3188 = vmatprep.subr.mxu0 %v3405_v20 }
 0x9ed   : > { %3186 = vmatmul.mubr.msk.f32.vlgmr.msra.gmra.mrb[24].mxu0 %vm858_vm3, %v1994_v37 }
 0x9ee   : > { %3189 = vmatpush3.xpose.msk.msra.mxu0 %vm858_vm3, %v2074_v38  ;;  %3190 = vmatprep.mubr.msk.f32.mxu0 %vm3406_vm2, %v3405_v20 }
 0x9ef   : > { %3198 = vmatprep.subr.mxu0 %v3405_v20 }
 0x9f1   : > { %3191 = vmatmul.mubr.msk.f32.vlgmr.msra.gmra.mrb[26].mxu0 %vm858_vm3, %v2072_v39 }
 0x9f2   : > { %3200 = vmatprep.mubr.msk.f32.mxu0 %vm3406_vm2, %v3405_v20 }
 0xa10   : > { %v1771_v40 = vpop.xlane.xlu1 %1770 }
 0xa11   : > { %v1775_v42 = vsub.f32 %v1688_v33, %v1771_v40 }
 0xa13   : > { %v1777_v43 = vmul.f32 1.442695, %v1775_v42 }
 0xa15   : > { %3320 = vpow2.f32 %v1777_v43 }
 0xa1f   : > { %v3321_v45 = vpop.eup %3320 }
 0xa20   : > { %v1781_v46 = vsel %vm858_vm3, %v3321_v45, 0.0 }
 0xa21   : > { %1782 = vadd.xlane.f32.xlu0 %v1781_v46 }
 0xa37   : > { %1791 = vrot.lane.b32.xlu0 %v3637_v41, %s3415_s27 }
 0xa3b   : > { %2247 = vrot.lane.b32.xlu0 %v3639_v44, %s3417_s30 }
 0xaae   : > { %v1783_v47 = vpop.xlane.xlu0 %1782 }
 0xaaf   : > { %3322 = vrcp.f32 %v1783_v47 }
 0xab2   : > { %v1792_v50 = vpop.permute.xlu0 %1791 }
 0xab3   : > { %3168 = vmatpush3.msra.mxu1 %v1792_v50 }
 0xab4   : > { %3177 = vmatprep.subr.bf16.mxu1 %v3405_v20 }
 0xab6   : > { %v2248_v51 = vpop.permute.xlu0 %2247 }
 0xab7   : > { %3199 = vmatpush3.msra.mxu0 %v2248_v51 }
 0xab8   : > { %3209 = vmatprep.subr.bf16.mxu0 %v3405_v20 }
 0xab9   : > { %v3323_v52 = vpop.eup %3322 }
 0xaba   : > { %v1789_v54 = vmul.f32 %v3323_v52, %v3321_v45 }
 0xabc   : > { %3170 = vmatmul.mubr.msk.f32.vlgmr.msra.gmra.mrb[10].mxu1 %vm858_vm3, %v1789_v54  ;;  %v1939_v55 = vpop.f32.mrb[22].mxu0 }
 0xabd   : > { %v3176_v56 = vpop.f32.mrb[23].mxu0  ;;  %3179 = vmatprep.mubr.msk.bf16.mxu1 %vm3406_vm2, %v3405_v20  ;;  %3178 = vmatpush3.bf16.msra.mxu1 %v1948_v1 }
 0xabe   : > { %3193 = vmatprep.subr.mxu1 %v3405_v20 }
 0xac0   : > { %v2067_v44 = vpop.f32.mrb[24].mxu0 }
 0xac1   : > { %v2068_v57 = vadd.f32 %v2067_v44, %v3662_v53  ;;  %v3187_v58 = vpop.f32.mrb[25].mxu0 }
 0xac3   : > { %v2149_v59 = vsel %vm858_vm3, %v2068_v57, -inf }
 0xac4   : > { %2150 = vmax.xlane.f32.xlu1 %v2149_v59  ;;  %v2145_v60 = vpop.f32.mrb[26].mxu0  ;;  %v3286_v59 = vld [vmem:[%s3571_s5] sm:$0xff]  }
 0xac5   : > { %v2146_v61 = vadd.f32 %v2145_v60, %v3662_v53  ;;  %v3192_v62 = vpop.f32.mrb[27].mxu0  ;;  %v3287_v60 = vld [vmem:[%s3571_s5 + $0x8] sm:$0xff]  }
 0xac7   : > { %v2152_v63 = vsel %vm858_vm3, %v2146_v61, -inf }
 0xac8   : > { %2153 = vmax.xlane.f32.xlu1 %v2152_v63 }
 0xb51   : > { %v2151_v2 = vpop.xlane.xlu1 %2150 }
 0xb52   : > { %v2155_v3 = vsub.f32 %v2068_v57, %v2151_v2 }
 0xb54   : > { %v2157_v4 = vmul.f32 1.442695, %v2155_v3 }
 0xb55   : > { %v2154_v7 = vpop.xlane.xlu1 %2153 }
 0xb56   : > { %3324 = vpow2.f32 %v2157_v4  ;;  %v2156_v8 = vsub.f32 %v2146_v61, %v2154_v7  ;;  %v3002_v7 = vld [vmem:[%s694_s16] ss:$0 sm:$0xff]  ;;  %s3984_s16 = sld [smem:[#allocation16_spill]] (!%p3019_p10) }
 0xb58   : > { %v2159_v9 = vmul.f32 1.442695, %v2156_v8 }
 0xb5a   : > { %3326 = vpow2.f32 %v2159_v9 }
 0xb60   : > { %v3325_v10 = vpop.eup %3324 }
 0xb61   : > { %v2161_v53 = vsel %vm858_vm3, %v3325_v10, 0.0 }
 0xb62   : > { %2162 = vadd.xlane.f32.xlu1 %v2161_v53  ;;  %v3003_v53 = vld [vmem:[%s697_s28] ss:$0 sm:$0xff] }
 0xb64   : > { %v3327_v11 = vpop.eup %3326 }
 0xb65   : > { %v2164_v12 = vsel %vm858_vm3, %v3327_v11, 0.0 }
 0xb66   : > { %2165 = vadd.xlane.f32.xlu1 %v2164_v12 }
 0xb77   : > { %2171 = vrot.lane.b32.xlu1 %v3637_v41, %s3417_s30 }
 0xb8f   : > { %v1863_v13 = vpop.f32.mrb[10].mxu1 }
 0xb90   : > { %v1943_v14 = vpack.c.bf16 %v1939_v55, %v1863_v13  ;;  %v3171_v15 = vpop.f32.mrb[11].mxu1 }
 0xb91   : > { %v3288_v15 = vld [vmem:[%s3581_s2] sm:$0xff]  }
 0xb92   : > { %3180 = vmatmul.mubr.msk.bf16.vlgmr.msra.gmra.mrb[12].mxu1 %vm858_vm3, %v1943_v14 }
 0xb93   : > { %3195 = vmatprep.mubr.msk.f32.mxu1 %vm3406_vm2, %v3405_v20 }
 0xbef   : > { %v2163_v16 = vpop.xlane.xlu1 %2162 }
 0xbf0   : > { %3328 = vrcp.f32 %v2163_v16  ;;  %v3289_v16 = vld [vmem:[%s3581_s2 + $0x8] sm:$0xff]  }
 0xbf3   : > { %v2166_v18 = vpop.xlane.xlu1 %2165 }
 0xbf4   : > { %3330 = vrcp.f32 %v2166_v18  ;;  %v3290_v18 = vld [vmem:[%s3581_s2 + $0x10] sm:$0xff]  }
 0xbf7   : > { %v2172_v19 = vpop.permute.xlu1 %2171 }
 0xbf8   : > { %3194 = vmatpush3.msra.mxu1 %v2172_v19  ;;  %v3291_v19 = vld [vmem:[%s3581_s2 + $0x18] sm:$0xff]  }
 0xbf9   : > { %3203 = vmatprep.subr.bf16.mxu1 %v3405_v20 }
 0xbfa   : > { %v3329_v22 = vpop.eup %3328 }
 0xbfb   : > { %v2169_v23 = vmul.f32 %v3329_v22, %v3325_v10  ;;  %v3292_v22 = vld [vmem:[%s3581_s2 + $0x20] sm:$0xff]  }
 0xbfd   : > { %3196 = vmatmul.mubr.msk.f32.vlgmr.msra.gmra.mrb[16].mxu1 %vm858_vm3, %v2169_v23  ;;  %v3293_v23 = vld [vmem:[%s3581_s2 + $0x28] sm:$0xff]  }
 0xbfe   : > { %v3331_v41 = vpop.eup %3330  ;;  %3205 = vmatprep.mubr.msk.bf16.mxu1 %vm3406_vm2, %v3405_v20  ;;  %3204 = vmatpush3.bf16.msra.mxu1 %v2328_v26 }
 0xbff   : > { %v2170_v24 = vmul.f32 %v3331_v41, %v3327_v11  ;;  %3217 = vmatprep.subr.bf16.mxu1 %v3405_v20  ;;  %v3294_v41 = vld [vmem:[%s3581_s2 + $0x30] sm:$0xff]  }
 0xc01   : > { %3201 = vmatmul.mubr.msk.f32.vlgmr.msra.gmra.mrb[28].mxu0 %vm858_vm3, %v2170_v24  ;;  %v3295_v24 = vld [vmem:[%s3581_s2 + $0x38] sm:$0xff]  }
 0xc02   : > { %3213 = vmatprep.mubr.msk.bf16.mxu0 %vm3406_vm2, %v3405_v20  ;;  %3210 = vmatpush3.bf16.msra.mxu0 %v3286_v59 }
 0xc03   : > { %3211 = vmatprep.subr.bf16.mxu0 %v3405_v20 }
 0xc06   : > { %3212 = vmatpush3.bf16.msra.mxu0 %v3287_v60 }
 0xc65   : > { %v1984_v27 = vpop.f32.mrb[12].mxu1 }
 0xc66   : > { %v1991_v28 = vadd.f32 %v1984_v27, %v3747_v17  ;;  %v3181_v29 = vpop.f32.mrb[13].mxu1  ;;  %v3001_v17 = vld [vmem:[%s3981_s7] ss:$0 sm:$0xff] }
 0xc67   : > { %v1987_v30 = vpop.f32.mrb[14].mxu1 }
 0xc68   : > { %v1992_v31 = vadd.f32 %v1987_v30, %v3749_v21  ;;  %v3182_v32 = vpop.f32.mrb[15].mxu1 }
 0xcd0   : > { %v2243_v33 = vpop.f32.mrb[16].mxu1 }
 0xcd1   : > { %v3197_v48 = vpop.f32.mrb[17].mxu1 }
 0xcd4   : > { %v2319_v49 = vpop.f32.mrb[28].mxu0 }
 0xcd5   : > { %v2323_v34 = vpack.c.bf16 %v2319_v49, %v2243_v33  ;;  %v3202_v35 = vpop.f32.mrb[29].mxu0 }
 0xcd7   : > { %3206 = vmatmul.mubr.msk.bf16.vlgmr.msra.gmra.mrb[20].mxu1 %vm858_vm3, %v2323_v34 }
 0xcd8   : > { %3233 = vmatprep.mubr.msk.bf16.mxu1 %vm3406_vm2, %v3405_v20  ;;  %3218 = vmatpush3.bf16.msra.mxu1 %v3288_v15 }
 0xcd9   : > { %3219 = vmatprep.subr.bf16.mxu1 %v3405_v20 }
 0xcdc   : > { %3220 = vmatpush3.bf16.msra.mxu1 %v3289_v16  ;;  %v2637_v16 = vld [vmem:[%s3985_s15] sm:$0x1] (!%p3019_p10) }
 0xcdd   : > { %3221 = vmatprep.subr.bf16.mxu1 %v3405_v20 }
 0xce0   : > { %3222 = vmatpush3.bf16.msra.mxu1 %v3290_v18 }
 0xce1   : > { %3223 = vmatprep.subr.bf16.mxu1 %v3405_v20 }
 0xce4   : > { %3224 = vmatpush3.bf16.msra.mxu1 %v3291_v19 }
 0xce5   : > { %3225 = vmatprep.subr.bf16.mxu1 %v3405_v20 }
 0xce8   : > { %3226 = vmatpush3.bf16.msra.mxu1 %v3292_v22  ;;  %v2719_v22 = vld [vmem:[%s3984_s16] sm:$0x1] (!%p3019_p10) }
 0xce9   : > { %3227 = vmatprep.subr.bf16.mxu1 %v3405_v20 }
 0xcec   : > { %3228 = vmatpush3.bf16.msra.mxu1 %v3293_v23 }
 0xced   : > { %3229 = vmatprep.subr.bf16.mxu1 %v3405_v20 }
 0xcf0   : > { %3230 = vmatpush3.bf16.msra.mxu1 %v3294_v41 }
 0xcf1   : > { %3231 = vmatprep.subr.bf16.mxu1 %v3405_v20 }
 0xcf4   : > { %3232 = vmatpush3.bf16.msra.mxu1 %v3295_v24  ;;  %v2720_v24 = vld [vmem:[%s3985_s15] sm:$0x1] (!%p3019_p10) }
 0xdaa   : > { %v2364_v36 = vpop.f32.mrb[20].mxu1 }
 0xdab   : > { %v2371_v37 = vadd.f32 %v2364_v36, %v1991_v28  ;;  %v3207_v38 = vpop.f32.mrb[21].mxu1 }
 0xdac   : > { %v2367_v21 = vpop.f32.mrb[22].mxu1 }
 0xdad   : > { %v2373_v39 = vadd.f32 %v2371_v37, %v3597_v5  ;;  %v2372_v40 = vadd.f32 %v2367_v21, %v1992_v31  ;;  %v3208_v42 = vpop.f32.mrb[23].mxu1 }
 0xdaf   : > { %v3821_v43 = vadd.f32 %v3001_v17, %v2373_v39  ;;  %v2374_v45 = vadd.f32 %v2372_v40, %v3599_v6  ;;  %v3010_v40 = vld [vmem:[%s713_s26] ss:$0 sm:$0xff]  ;;  %s2634_s26 = scalar_lea.vmem (!%p3019_p10), [#allocation2], %s2633_s22 }
 0xdb1   : > { %v3824_v46 = vadd.f32 %v3001_v17, %v2374_v45  ;;  %v2386_v47 = vsel %vm731_vm1, %v3821_v43, 0.0 }
 0xdb2   : > { %2387 = vadd.xlane.f32.xlu0 %v2386_v47 }
 0xdb3   : > { %v2389_v50 = vsel %vm731_vm1, %v3824_v46, 0.0 }
 0xdb4   : > { %2390 = vadd.xlane.f32.xlu1 %v2389_v50 }
 0xe3f   : > { %v2388_v51 = vpop.xlane.xlu0 %2387 }
 0xe40   : > { %v2392_v5 = vmul.f32 0.03125, %v2388_v51 }
 0xe41   : > { %v2391_v52 = vpop.xlane.xlu1 %2390 }
 0xe42   : > { %v2394_v54 = vsub.f32 %v3821_v43, %v2392_v5  ;;  %v2393_v55 = vmul.f32 0.03125, %v2391_v52 }
 0xe44   : > { %v2395_v6 = vsub.f32 %v3824_v46, %v2393_v55  ;;  %v2396_v56 = vmul.f32 %v2394_v54, %v2394_v54 }
 0xe46   : > { %v2398_v44 = vsel %vm731_vm1, %v2396_v56, 0.0  ;;  %v2397_v57 = vmul.f32 %v2395_v6, %v2395_v6 }
 0xe47   : > { %2399 = vadd.xlane.f32.xlu0 %v2398_v44 }
 0xe48   : > { %v2401_v58 = vsel %vm731_vm1, %v2397_v57, 0.0 }
 0xe4b   : > { %2402 = vadd.xlane.f32.xlu0 %v2401_v58 }
 0xed4   : > { %v2400_v61 = vpop.xlane.xlu0 %2399 }
 0xed5   : > { %v2404_v62 = vmul.f32 0.03125, %v2400_v61 }
 0xed7   : > { %v2406_v63 = vadd.f32 1e-05, %v2404_v62 }
 0xed8   : > { %v2403_v0 = vpop.xlane.xlu0 %2402 }
 0xed9   : > { %3332 = vrsqrt.f32 %v2406_v63  ;;  %v2405_v1 = vmul.f32 0.03125, %v2403_v0 }
 0xedb   : > { %v2407_v2 = vadd.f32 1e-05, %v2405_v1  ;;  %v3344_v1 = vld [vmem:[%s3983_s25] sm:$0xff] (!%p3019_p10)  }
 0xedd   : > { %3334 = vrsqrt.f32 %v2407_v2  ;;  %v3346_v2 = vld [vmem:[%s3983_s25] sm:$0xff] (!%p3019_p10)  }
 0xee3   : > { %v3333_v3 = vpop.eup %3332 }
 0xee4   : > { %v2410_v4 = vmul.f32 %v3333_v3, %v2394_v54  ;;  %v3418_v3 = vmov (!%p3019_p10), 0.0  }
 0xee5   : > { %3237 = vmatprep.subr.bf16.mxu0 (!%p3019_p10), %v3418_v3  ;;  %3245 = vmatprep.subr.bf16.mxu1 (!%p3019_p10), %v3418_v3 }
 0xee6   : > { %v2418_v9 = vmul.f32 %v3002_v7, %v2410_v4  ;;  %v3345_v4 = vld [vmem:[%s3983_s25 + $0x8] sm:$0xff] (!%p3019_p10)  }
 0xee7   : > { %v3335_v8 = vpop.eup %3334 }
 0xee8   : > { %v2411_v10 = vmul.f32 %v3335_v8, %v2395_v6  ;;  %v2426_v12 = vadd.f32 %v3003_v53, %v2418_v9 }
 0xeea   : > { %v2419_v11 = vmul.f32 %v3002_v7, %v2411_v10  ;;  %v3347_v7 = vld [vmem:[%s3983_s25 + $0x8] sm:$0xff] (!%p3019_p10)  }
 0xeec   : > { %v2427_v13 = vadd.f32 %v3003_v53, %v2419_v11 }
 0xeee   : > { %v2428_v14 = vpack.c.bf16 %v2427_v13, %v2426_v12 }
 0xef0   : > { %3214 = vmatmul.mubr.msk.bf16.vlgmr.msra.gmra.mrb[32].mxu0 %vm731_vm1, %v2428_v14  ;;  %v2636_v14 = vld [vmem:[%s3984_s16] sm:$0x1] (!%p3019_p10) }
 0xef1   : > { %3238 = vmatpush3.bf16.msra.mxu0 (!%p3019_p10), %v3344_v1  ;;  %3241 = vmatprep.mubr.msk.bf16.mxu0 (!%p3019_p10), %vm3419_vm7, %v3418_v3 }
 0xef2   : > { %3239 = vmatprep.subr.bf16.mxu0 (!%p3019_p10), %v3418_v3 }
 0xef5   : > { %3240 = vmatpush3.bf16.msra.mxu0 (!%p3019_p10), %v3345_v4 }
 0xfc3   : > { %v2489_v26 = vpop.f32.mrb[32].mxu0 }
 0xfc4   : > { %v2490_v27 = vadd.f32 %v3004_v25, %v2489_v26  ;;  %v3215_v28 = vpop.f32.mrb[33].mxu0 }
 0xfc5   : > { %v2492_v29 = vpop.f32.mrb[34].mxu0 }
 0xfc6   : > { %v3008_v30 = vmul.f32 -1.702, %v2490_v27  ;;  %v2493_v31 = vadd.f32 %v3004_v25, %v2492_v29  ;;  %v3216_v32 = vpop.f32.mrb[35].mxu0 }
 0xfc8   : > { %v2500_v33 = vmul.f32 1.442695, %v3008_v30  ;;  %v3009_v48 = vmul.f32 -1.702, %v2493_v31 }
 0xfca   : > { %3336 = vpow2.f32 %v2500_v33  ;;  %v2502_v49 = vmul.f32 1.442695, %v3009_v48 }
 0xfcc   : > { %3338 = vpow2.f32 %v2502_v49 }
 0xfd4   : > { %v3337_v20 = vpop.eup %3336 }
 0xfd5   : > { %v2504_v34 = vadd.f32 1.0, %v3337_v20 }
 0xfd6   : > { %v3339_v35 = vpop.eup %3338 }
 0xfd7   : > { %3340 = vrcp.f32 %v2504_v34  ;;  %v2505_v36 = vadd.f32 1.0, %v3339_v35 }
 0xfd9   : > { %3342 = vrcp.f32 %v2505_v36 }
 0xfe1   : > { %v3341_v37 = vpop.eup %3340 }
 0xfe2   : > { %v2510_v17 = vmul.f32 %v3341_v37, %v2490_v27 }
 0xfe3   : > { %v3343_v38 = vpop.eup %3342 }
 0xfe4   : > { %v2511_v21 = vmul.f32 %v3343_v38, %v2493_v31 }
 0xfe6   : > { %v2512_v39 = vpack.c.bf16 %v2511_v21, %v2510_v17 }
 0xfe8   : > { %3234 = vmatmul.mubr.bf16.vlgmr.msra.gmra.mrb[24].mxu1 %v2512_v39 }
 0xfe9   : > { %3246 = vmatpush3.bf16.msra.mxu1 (!%p3019_p10), %v3346_v2  ;;  %3249 = vmatprep.mubr.msk.bf16.mxu1 (!%p3019_p10), %vm3419_vm7, %v3418_v3 }
 0xfea   : > { %3247 = vmatprep.subr.bf16.mxu1 (!%p3019_p10), %v3418_v3 }
 0xfed   : > { %3248 = vmatpush3.bf16.msra.mxu1 (!%p3019_p10), %v3347_v7 }
0x10bb   : > { %v2618_v42 = vpop.f32.mrb[24].mxu1 }
0x10bc   : > { %v2619_v45 = vadd.f32 %v3010_v40, %v2618_v42  ;;  %v3235_v47 = vpop.f32.mrb[25].mxu1  ;;  %2632 = sbr.rel (%p3019_p10) target bundleno = 4832 (0x12e0), region = 96 }
0x10bd   : > { %v2621_v50 = vpop.f32.mrb[26].mxu1 }
0x10be   : > { %v2625_v51 = vadd.f32 %v2619_v45, %v3821_v43  ;;  %v2622_v5 = vadd.f32 %v3010_v40, %v2621_v50  ;;  %v3236_v52 = vpop.f32.mrb[27].mxu1 }
0x10c0   : > { %2627 = vst.msk [vmem:[#allocation2] sm:$0xff] %vm731_vm1, %v2625_v51  ;;  %v2626_v54 = vadd.f32 %v2622_v5, %v3824_v46 }
0x10c2   : > { %2628 = vst.msk [vmem:[#allocation2 + $0x8] sm:$0xff] %vm731_vm1, %v2626_v54 }
0x10c9   : > { %v2635_v55 = vld [vmem:[%s2634_s26] sm:$0x1]  ;;  %v3024_v6 = vld [vmem:[%s2869_s24 + $0x8] sm:$0x1] }
0x10ca   : > { %v2639_v43 = vsel %vm2638_vm6, %v2635_v55, 0.0  ;;  %v2721_v56 = vsel %vm2638_vm6, %v3024_v6, 0.0 }
0x10cb   : > { %2640 = vadd.xlane.f32.xlu0 %v2639_v43 }
0x10cf   : > { %2722 = vadd.xlane.f32.xlu0 %v2721_v56 }
0x1158   : > { %v2641_v44 = vpop.xlane.xlu0 %2640 }
0x1159   : > { %v2642_v46 = vmul.f32 0.03125, %v2641_v44 }
0x115b   : > { %v2643_v57 = vsub.f32 %v2635_v55, %v2642_v46 }
0x115c   : > { %v2723_v58 = vpop.xlane.xlu0 %2722 }
0x115d   : > { %v2724_v59 = vmul.f32 0.03125, %v2723_v58  ;;  %v2644_v60 = vmul.f32 %v2643_v57, %v2643_v57 }
0x115f   : > { %v2725_v61 = vsub.f32 %v3024_v6, %v2724_v59  ;;  %v2645_v62 = vsel %vm2638_vm6, %v2644_v60, 0.0 }
0x1160   : > { %2646 = vadd.xlane.f32.xlu1 %v2645_v62 }
0x1161   : > { %v2726_v63 = vmul.f32 %v2725_v61, %v2725_v61 }
0x1163   : > { %v2727_v0 = vsel %vm2638_vm6, %v2726_v63, 0.0 }
0x1164   : > { %2728 = vadd.xlane.f32.xlu1 %v2727_v0 }
0x11ed   : > { %v2647_v8 = vpop.xlane.xlu1 %2646 }
0x11ee   : > { %v2648_v9 = vmul.f32 0.03125, %v2647_v8 }
0x11f0   : > { %v2649_v10 = vadd.f32 1e-05, %v2648_v9 }
0x11f1   : > { %v2729_v53 = vpop.xlane.xlu1 %2728 }
0x11f2   : > { %3348 = vrsqrt.f32 %v2649_v10  ;;  %v2730_v11 = vmul.f32 0.03125, %v2729_v53 }
0x11f4   : > { %v2731_v12 = vadd.f32 1e-05, %v2730_v11 }
0x11f6   : > { %3350 = vrsqrt.f32 %v2731_v12 }
0x11fc   : > { %v3349_v13 = vpop.eup %3348 }
0x11fd   : > { %v2651_v15 = vmul.f32 %v3349_v13, %v2643_v57 }
0x11ff   : > { %v2652_v18 = vmul.f32 %v2651_v15, %v2636_v14 }
0x1200   : > { %v3351_v19 = vpop.eup %3350 }
0x1201   : > { %v2653_v23 = vadd.f32 %v2652_v18, %v2637_v16  ;;  %v2733_v41 = vmul.f32 %v3351_v19, %v2725_v61 }
0x1203   : > { %v2654_v25 = vpack.c.bf16 %v2653_v23, %v2653_v23  ;;  %v2734_v26 = vmul.f32 %v2733_v41, %v2719_v22 }
0x1205   : > { %3242 = vmatmul.mubr.msk.bf16.vlgmr.msra.gmra.mrb[0].mxu0 %vm731_vm1, %v2654_v25  ;;  %v2735_v27 = vadd.f32 %v2734_v26, %v2720_v24 }
0x1207   : > { %v2736_v28 = vpack.c.bf16 %v2735_v27, %v2735_v27 }
0x1209   : > { %3250 = vmatmul.mubr.msk.bf16.vlgmr.msra.gmra.mrb[0].mxu1 %vm731_vm1, %v2736_v28 }
0x12d8   : > { %v2708_v29 = vpop.f32.mrb[0].mxu0 }
0x12d9   : > { %2714 = vst.msk [vmem:[#allocation5] sm:$0x1] %vm2638_vm6, %v2708_v29  ;;  %v3243_v30 = vpop.f32.mrb[1].mxu0 }
0x12da   : > { %v2711_v31 = vpop.f32.mrb[2].mxu0 }
0x12db   : > { %v3244_v32 = vpop.f32.mrb[3].mxu0 }
0x12dc   : > { %v2790_v33 = vpop.f32.mrb[0].mxu1 }
0x12dd   : > { %2796 = vst.msk [vmem:[#allocation5 + $0x1] sm:$0x1] %vm2638_vm6, %v2790_v33  ;;  %v3251_v48 = vpop.f32.mrb[1].mxu1 }
0x12de   : > { %v2793_v49 = vpop.f32.mrb[2].mxu1 }
0x12df   : > { %v3252_v20 = vpop.f32.mrb[3].mxu1 }
0x12e0 PF: > { %p3257_p11 = scmp.eq.s32.totalorder %s3525_s1, 1  ;;  %s3420_s24 = smov [#allocation5]  }
0x12e1   : > { %s2804_s23 = sshll.u32 %s3420_s24, 4  ;;  %s2805_s23 = int_to_ptr.vmem [resolvable:$true] %s2804_s23 }
0x12e2   : > { %s3364_s27 = scalar_lea.vmem %s2805_s23, 32  ;;  %p3371_p1 = scmp.lt.s32.totalorder %s2805_s23, %s2805_s23 }
0x12e3   : > { %p3365_p12 = scmp.ne.s32.totalorder %s2805_s23, %s3364_s27  ;;  %p3372_p2 = scmp.lt.s32.totalorder %s3364_s27, %s3364_s27 }
0x12e5   : > { %p3366_p13 = pnand %p3365_p12, %p3257_p11  ;;  %p3373_p3 = por %p3372_p2, %p3371_p1 }
0x12e7   : > { %p3367_p0 = pneg %p3366_p13 }
0x12e9   : > { %p3374_p4 = pnand %p3373_p3, %p3367_p0 }
0x12eb   : > { %3377 = shalt.err (!%p3374_p4)
}
0x12ec   : > { %s3986_s20 = sld [smem:[#allocation19_spill]] }
0x12f2   : > { %s3378_s7 = scalar_lea.hbm %s3986_s20, 32 }
0x12f3   : > { %p3379_p5 = scmp.ne.s32.totalorder %s3986_s20, %s3378_s7  ;;  %p3384_p8 = scmp.lt.u32.totalorder %s3378_s7, %s3986_s20 }
0x12f5   : > { %p3380_p6 = pnand %p3379_p5, %p3257_p11 }
0x12f7   : > { %p3381_p7 = pneg %p3380_p6 }
0x12f9   : > { %p3386_p9 = pnand %p3384_p8, %p3381_p7 }
0x12fb   : > { %3389 = shalt.err (!%p3386_p9)
}
0x12fc   : > { %3254 = dma.vmem_to_hbm [thread:$0]  (%p3257_p11), %s2805_s23, 32, %s3986_s20, [#allocation6]  }
0x12fd   : > { %3397 = dma.done.wait (%p3257_p11), [#allocation6], 32  }
0x12fe   : > { %3399 = vsyncadd (%p3257_p11), [#allocation6], 4294967264 }
0x12ff PF: > { %s3987_s2 = sld [smem:[#allocation9_spill]] }
0x1305   : > { %s35_s19 = sadd.s32 1, %s3987_s2  }
0x1306   : > { %p32_p10 = scmp.ge.s32.totalorder %s35_s19, 4  }
0x1308   :  { %34 = sbr.rel (!%p32_p10) target bundleno = 24 (0x18), region = 158 }
0x130f   :  { %2817 = vsyncpa [#allocation6], 1 }
0x1310   :  { %2819 = vsyncpa [#allocation6 + $0x1], 1 }

</bundles_post_ra>
